<compile_context>
chip_gen: v6e
topology: v6e:2x2x1
jax: 0.10.0
libtpu: 0.0.40
codegen_flags: <defaults>
</compile_context>

<pallas_src>
import functools
import math

import jax
import jax.numpy as jnp
from jax.experimental import pallas as pl
from jax.experimental.pallas import tpu as pltpu


def _vmem_limit_bytes():
    # ~3/4 of physical VMEM, capped at 100 MiB: ~96 MiB on v5e/v6e (128 MiB),
    # 48 MiB on v7x (64 MiB).  Falls back to a v7x-safe value if the query fails.
    try:
        cap = int(pltpu.get_tpu_info().vmem_capacity_bytes)
    except Exception:
        cap = 64 * 1024 * 1024
    return min((cap * 3) // 4, 100 * 1024 * 1024)


_VMEM_LIMIT = _vmem_limit_bytes()


def _pick_tile(dim, target, align):
    """Pick (tile, padded_dim).  dim <= target -> one full-dim block (always legal)."""
    if dim <= target:
        return dim, dim
    tile = max(align, (target // align) * align)
    padded = -(-dim // tile) * tile
    return tile, padded


# ----------------------------------------------------------------------------
# Pallas kernels
# ----------------------------------------------------------------------------
def _matmul_bias_kernel(x_ref, w_ref, b_ref, o_ref):
    # Single full-K MXU pass: x @ W + b (W already bf16, f32 accumulation).
    o_ref[...] = (
        jnp.dot(x_ref[...].astype(jnp.bfloat16), w_ref[...],
                preferred_element_type=jnp.float32)
        + b_ref[...]
    ).astype(o_ref.dtype)


def _matmul_bias_acc_kernel(x_ref, w_ref, b_ref, o_ref, acc_ref):
    # K-tiled x @ W + b with f32 accumulator (only used for very large K).
    k = pl.program_id(2)

    @pl.when(k == 0)
    def _init():
        acc_ref[...] = jnp.zeros_like(acc_ref)

    acc_ref[...] += jnp.dot(x_ref[...].astype(jnp.bfloat16), w_ref[...],
                            preferred_element_type=jnp.float32)

    @pl.when(k == pl.num_programs(2) - 1)
    def _store():
        o_ref[...] = (acc_ref[...] + b_ref[...]).astype(o_ref.dtype)


def _proj_add_ln_kernel(a_ref, w_ref, r_ref, g_ref, b_ref, o_ref):
    # Fused: LayerNorm(attn @ Wo + residual), eps = 1e-5 (PyTorch default).
    proj = jnp.dot(a_ref[...].astype(jnp.bfloat16), w_ref[...],
                   preferred_element_type=jnp.float32)
    y = proj + r_ref[...].astype(jnp.float32)
    mean = jnp.mean(y, axis=-1, keepdims=True)
    var = jnp.mean(jnp.square(y - mean), axis=-1, keepdims=True)
    yn = (y - mean) * jax.lax.rsqrt(var + 1e-5)
    o_ref[...] = (yn * g_ref[...] + b_ref[...]).astype(o_ref.dtype)


def _ffn_ln_kernel(x_ref, w1_ref, b1_ref, w2_ref, b2_ref, g_ref, be_ref,
                   o_ref, acc_ref):
    # Fused FFN tiled over the 4*D hidden axis (ReLU is elementwise, so hidden
    # tiles are independent); LayerNorm(x + FFN(x)) in the finalize step.
    h_idx = pl.program_id(1)

    @pl.when(h_idx == 0)
    def _init():
        acc_ref[...] = jnp.zeros_like(acc_ref)

    h = jnp.dot(x_ref[...].astype(jnp.bfloat16), w1_ref[...],
                preferred_element_type=jnp.float32) + b1_ref[...]
    h = jnp.maximum(h, 0.0)
    acc_ref[...] += jnp.dot(h.astype(jnp.bfloat16), w2_ref[...],
                            preferred_element_type=jnp.float32)

    @pl.when(h_idx == pl.num_programs(1) - 1)
    def _finalize():
        y = x_ref[...].astype(jnp.float32) + acc_ref[...] + b2_ref[...]
        mean = jnp.mean(y, axis=-1, keepdims=True)
        var = jnp.mean(jnp.square(y - mean), axis=-1, keepdims=True)
        yn = (y - mean) * jax.lax.rsqrt(var + 1e-5)
        o_ref[...] = (yn * g_ref[...] + be_ref[...]).astype(o_ref.dtype)


def _flash_attention_kernel(q_ref, k_ref, v_ref, bias_ref, o_ref,
                            m_sc, l_sc, acc_sc, *, scale):
    # One grid step = one (batch*head, q-tile, kv-tile).  Online softmax so the
    # (Sq, Sk) score tensor never materializes beyond a (tq, tkv) tile.
    ki = pl.program_id(2)

    @pl.when(ki == 0)
    def _init():
        m_sc[...] = jnp.full_like(m_sc, -jnp.inf)
        l_sc[...] = jnp.zeros_like(l_sc)
        acc_sc[...] = jnp.zeros_like(acc_sc)

    # Fold 1/sqrt(hd) into q (a (tq, hd) multiply instead of (tq, tkv)).
    q = (q_ref[0].astype(jnp.float32) * scale).astype(jnp.bfloat16)   # (tq, hd)
    k = k_ref[0].astype(jnp.bfloat16)                                 # (tkv, hd)
    v = v_ref[0].astype(jnp.bfloat16)                                 # (tkv, hd)

    s = jax.lax.dot_general(q, k, (((1,), (1,)), ((), ())),
                            preferred_element_type=jnp.float32)       # (tq, tkv)
    s = s + bias_ref[...]                                             # 0 / -1e20

    m_prev = m_sc[...]
    m_new = jnp.maximum(m_prev, jnp.max(s, axis=-1, keepdims=True))
    alpha = jnp.exp(m_prev - m_new)
    p = jnp.exp(s - m_new)
    l_sc[...] = alpha * l_sc[...] + jnp.sum(p, axis=-1, keepdims=True)
    acc_sc[...] = alpha * acc_sc[...] + jnp.dot(p.astype(jnp.bfloat16), v,
                                                preferred_element_type=jnp.float32)
    m_sc[...] = m_new

    @pl.when(ki == pl.num_programs(2) - 1)
    def _finalize():
        # Denominator applied once to the (tq, hd) accumulator, not (tq, tkv).
        o_ref[0] = (acc_sc[...] * pl.reciprocal(l_sc[...], approx=True)
                    ).astype(o_ref.dtype)
    # TODO(synk): with head_dim < 128 the output store is lane-sparse (masked
    # vst); a lane-dense (Sq, H*hd) writeback layout would need an in-kernel
    # relayout matching the reference's flat .view and is left for a follow-up.


# ----------------------------------------------------------------------------
# Pallas wrappers
# ----------------------------------------------------------------------------
def linear_pallas(x, w, b=None, *, out_dtype=None,
                  tm_target=512, tn_target=512, tk_target=512,
                  full_k_threshold=2048):
    """x: (..., K) @ w: (K, N) + b.  Full-K single pass when K fits."""
    lead = x.shape[:-1]
    K = x.shape[-1]
    N = w.shape[-1]
    x2 = x.reshape(-1, K)
    M = x2.shape[0]
    out_dtype = x.dtype if out_dtype is None else out_dtype
    if b is None:
        b = jnp.zeros((N,), jnp.float32)
    b = b.astype(jnp.float32)
    w = w.astype(jnp.bfloat16)          # no-op when already stored bf16

    tm, Mp = _pick_tile(M, tm_target, 8)
    tn, Np = _pick_tile(N, tn_target, 128)

    xp, wp, bp = x2, w, b
    if Np != N:
        wp = jnp.pad(wp, ((0, 0), (0, Np - N)))
        bp = jnp.pad(bp, (0, Np - N))

    # TODO(synk): ragged M tails are padded; a masked final tile would avoid the
    # extra HBM copy (common shapes divide evenly so no padding happens here).
    if K <= full_k_threshold:
        if Mp != M:
            xp = jnp.pad(xp, ((0, Mp - M), (0, 0)))
        out = pl.pallas_call(
            _matmul_bias_kernel,
            grid=(Mp // tm, Np // tn),
            in_specs=[
                pl.BlockSpec((tm, K), lambda i, j: (i, 0)),
                pl.BlockSpec((K, tn), lambda i, j: (0, j)),
                pl.BlockSpec((1, tn), lambda i, j: (0, j)),
            ],
            out_specs=pl.BlockSpec((tm, tn), lambda i, j: (i, j)),
            out_shape=jax.ShapeDtypeStruct((Mp, Np), out_dtype),
            compiler_params=pltpu.CompilerParams(
                dimension_semantics=("parallel", "parallel"),
                vmem_limit_bytes=_VMEM_LIMIT),
        )(xp, wp, bp.reshape(1, Np))
    else:
        tk, Kp = _pick_tile(K, tk_target, 128)
        if Mp != M or Kp != K:
            xp = jnp.pad(xp, ((0, Mp - M), (0, Kp - K)))
        if Kp != K:
            wp = jnp.pad(wp, ((0, Kp - K), (0, 0)))
        out = pl.pallas_call(
            _matmul_bias_acc_kernel,
            grid=(Mp // tm, Np // tn, Kp // tk),
            in_specs=[
                pl.BlockSpec((tm, tk), lambda i, j, k: (i, k)),
                pl.BlockSpec((tk, tn), lambda i, j, k: (k, j)),
                pl.BlockSpec((1, tn), lambda i, j, k: (0, j)),
            ],
            out_specs=pl.BlockSpec((tm, tn), lambda i, j, k: (i, j)),
            out_shape=jax.ShapeDtypeStruct((Mp, Np), out_dtype),
            scratch_shapes=[pltpu.VMEM((tm, tn), jnp.float32)],
            compiler_params=pltpu.CompilerParams(
                dimension_semantics=("parallel", "parallel", "arbitrary"),
                vmem_limit_bytes=_VMEM_LIMIT),
        )(xp, wp, bp.reshape(1, Np))

    return out[:M, :N].reshape(*lead, N)


def proj_add_ln_pallas(x, w, residual, gamma, beta, tm_target=512):
    """LayerNorm(x @ w + residual); x: (B, S, D) (bf16 ok); residual f32."""
    B, S, D = x.shape
    M = B * S
    x2 = x.reshape(M, D)
    r2 = residual.reshape(M, D)
    tm, Mp = _pick_tile(M, tm_target, 8)
    if Mp != M:
        x2 = jnp.pad(x2, ((0, Mp - M), (0, 0)))
        r2 = jnp.pad(r2, ((0, Mp - M), (0, 0)))
    out = pl.pallas_call(
        _proj_add_ln_kernel,
        grid=(Mp // tm,),
        in_specs=[
            pl.BlockSpec((tm, D), lambda i: (i, 0)),
            pl.BlockSpec((D, D), lambda i: (0, 0)),     # Wo resident (bf16)
            pl.BlockSpec((tm, D), lambda i: (i, 0)),
            pl.BlockSpec((1, D), lambda i: (0, 0)),
            pl.BlockSpec((1, D), lambda i: (0, 0)),
        ],
        out_specs=pl.BlockSpec((tm, D), lambda i: (i, 0)),
        out_shape=jax.ShapeDtypeStruct((Mp, D), jnp.float32),
        compiler_params=pltpu.CompilerParams(
            dimension_semantics=("parallel",), vmem_limit_bytes=_VMEM_LIMIT),
    )(x2, w.astype(jnp.bfloat16), r2, gamma.reshape(1, D), beta.reshape(1, D))
    return out[:M].reshape(B, S, D)


def ffn_pallas(x, p, tm_target=512, th_target=1024):
    """Fused FeedForwardNetwork + residual LayerNorm, tiled over rows and hidden."""
    B, S, D = x.shape
    M = B * S
    H4 = p["w1"].shape[1]
    x2 = x.reshape(M, D)
    tm, Mp = _pick_tile(M, tm_target, 8)
    th, H4p = _pick_tile(H4, th_target, 128)
    if Mp != M:
        x2 = jnp.pad(x2, ((0, Mp - M), (0, 0)))
    w1 = p["w1"].astype(jnp.bfloat16)
    w2 = p["w2"].astype(jnp.bfloat16)
    b1 = p["b1"].astype(jnp.float32).reshape(1, H4)
    if H4p != H4:
        w1 = jnp.pad(w1, ((0, 0), (0, H4p - H4)))
        w2 = jnp.pad(w2, ((0, H4p - H4), (0, 0)))
        b1 = jnp.pad(b1, ((0, 0), (0, H4p - H4)))
    out = pl.pallas_call(
        _ffn_ln_kernel,
        grid=(Mp // tm, H4p // th),
        in_specs=[
            pl.BlockSpec((tm, D), lambda i, h: (i, 0)),
            pl.BlockSpec((D, th), lambda i, h: (0, h)),   # w1 hidden tile
            pl.BlockSpec((1, th), lambda i, h: (0, h)),
            pl.BlockSpec((th, D), lambda i, h: (h, 0)),   # w2 hidden tile
            pl.BlockSpec((1, D), lambda i, h: (0, 0)),
            pl.BlockSpec((1, D), lambda i, h: (0, 0)),
            pl.BlockSpec((1, D), lambda i, h: (0, 0)),
        ],
        out_specs=pl.BlockSpec((tm, D), lambda i, h: (i, 0)),
        out_shape=jax.ShapeDtypeStruct((Mp, D), jnp.float32),
        scratch_shapes=[pltpu.VMEM((tm, D), jnp.float32)],
        compiler_params=pltpu.CompilerParams(
            dimension_semantics=("parallel", "arbitrary"),
            vmem_limit_bytes=_VMEM_LIMIT),
    )(x2, w1, b1, w2, p["b2"].reshape(1, D),
      p["ln_g"].reshape(1, D), p["ln_b"].reshape(1, D))
    return out[:M].reshape(B, S, D)


def attention_core_pallas(q, k, v, mask_bias, scale, *,
                          tq_target=256, tkv_target=512):
    """Flash-style attention.  q: (B, H, Sq, hd), k/v: (B, H, Sk, hd)."""
    B, H, Sq, hd = q.shape
    Sk = k.shape[2]
    BH = B * H
    q3 = q.reshape(BH, Sq, hd)
    k3 = k.reshape(BH, Sk, hd)
    v3 = v.reshape(BH, Sk, hd)

    tq, Sqp = _pick_tile(Sq, tq_target, 8)
    tkv, Skp = _pick_tile(Sk, tkv_target, 128)   # lane dim of the bias tile

    if Sqp != Sq:
        q3 = jnp.pad(q3, ((0, 0), (0, Sqp - Sq), (0, 0)))
    if Skp != Sk:
        k3 = jnp.pad(k3, ((0, 0), (0, Skp - Sk), (0, 0)))
        v3 = jnp.pad(v3, ((0, 0), (0, Skp - Sk), (0, 0)))

    bias = jnp.zeros((Sqp, Skp), jnp.float32)
    if mask_bias is not None:
        bias = bias.at[:Sq, :Sk].set(mask_bias)
    if Skp != Sk:
        bias = bias.at[:, Sk:].set(jnp.float32(-1e20))   # exclude padded keys

    out = pl.pallas_call(
        functools.partial(_flash_attention_kernel, scale=scale),
        grid=(BH, Sqp // tq, Skp // tkv),
        in_specs=[
            pl.BlockSpec((1, tq, hd), lambda b, qi, ki: (b, qi, 0)),
            pl.BlockSpec((1, tkv, hd), lambda b, qi, ki: (b, ki, 0)),
            pl.BlockSpec((1, tkv, hd), lambda b, qi, ki: (b, ki, 0)),
            pl.BlockSpec((tq, tkv), lambda b, qi, ki: (qi, ki)),
        ],
        out_specs=pl.BlockSpec((1, tq, hd), lambda b, qi, ki: (b, qi, 0)),
        out_shape=jax.ShapeDtypeStruct((BH, Sqp, hd), jnp.bfloat16),
        scratch_shapes=[pltpu.VMEM((tq, 1), jnp.float32),
                        pltpu.VMEM((tq, 1), jnp.float32),
                        pltpu.VMEM((tq, hd), jnp.float32)],
        compiler_params=pltpu.CompilerParams(
            dimension_semantics=("parallel", "parallel", "arbitrary"),
            vmem_limit_bytes=_VMEM_LIMIT),
    )(q3, k3, v3, bias)
    return out[:, :Sq, :].reshape(B, H, Sq, hd)


# ----------------------------------------------------------------------------
# Model forward (mirrors the PyTorch module exactly, inference mode)
# ----------------------------------------------------------------------------
def _attend_project(p, q, k, v, residual, n_heads, hidden_dim, mask_bias, B, S, D):
    # Replicate torch .view(B, n_heads, -1, hidden_dim): a plain row-major
    # reshape (NOT a head-split transpose) -- matches the reference exactly.
    q4 = q.reshape(B, n_heads, -1, hidden_dim)
    k4 = k.reshape(B, n_heads, -1, hidden_dim)
    v4 = v.reshape(B, n_heads, -1, hidden_dim)
    attn = attention_core_pallas(q4, k4, v4, mask_bias,
                                 1.0 / math.sqrt(hidden_dim))
    attn = attn.reshape(B, S, D)          # torch .view(B, seq_length, d_model)
    # Fused: attention_linear (bias=False) + dropout(identity) + residual + LN.
    return proj_add_ln_pallas(attn, p["wo"], residual, p["ln_g"], p["ln_b"])


def mha_self_forward(p, x, n_heads, hidden_dim, mask_bias=None):
    B, S, D = x.shape
    # Pre-fused QKV weight (concatenated once at init); bf16 activations out.
    qkv = linear_pallas(x, p["wqkv"], out_dtype=jnp.bfloat16)
    q, k, v = jnp.split(qkv, 3, axis=-1)
    return _attend_project(p, q, k, v, x, n_heads, hidden_dim, mask_bias, B, S, D)


def mha_cross_forward(p, qk_in, v_in, n_heads, hidden_dim, mask_bias=None):
    B, Sq, D = qk_in.shape
    qk = linear_pallas(qk_in, p["wqk"], out_dtype=jnp.bfloat16)
    q, k = jnp.split(qk, 2, axis=-1)
    v = linear_pallas(v_in, p["wv"], out_dtype=jnp.bfloat16)
    # NOTE: reference uses pre_value (= v_in) as the residual; reproduced verbatim.
    return _attend_project(p, q, k, v, v_in, n_heads, hidden_dim, mask_bias, B, Sq, D)


def encoder_block(p, x, n_heads, hidden_dim):
    a = mha_self_forward(p["mha"], x, n_heads, hidden_dim, mask_bias=None)
    return ffn_pallas(a, p["ffn"])


def decoder_block(p, target, enc_out, target_mask_bias, n_heads, hidden_dim):
    pre_attention = mha_self_forward(p["mha1"], target, n_heads, hidden_dim,
                                     mask_bias=target_mask_bias)
    # Reference passes (enc_out, enc_out, pre_attention): query/key from enc_out,
    # value & residual from pre_attention; reproduced verbatim.
    attention = mha_cross_forward(p["mha2"], enc_out, pre_attention,
                                  n_heads, hidden_dim, mask_bias=None)
    return ffn_pallas(attention, p["ffn"])


def positional_encoding(max_len, d_model):
    pos = jnp.arange(max_len, dtype=jnp.float32)[:, None]
    _2i = jnp.arange(0, d_model, 2, dtype=jnp.float32)
    angle = pos / (10000.0 ** (_2i / d_model))
    enc = jnp.zeros((max_len, d_model), jnp.float32)
    enc = enc.at[:, 0::2].set(jnp.sin(angle))
    enc = enc.at[:, 1::2].set(jnp.cos(angle))
    return enc


def transformer_forward(params, source_ids, target_ids, *, n_heads, hidden_dim):
    S_src = source_ids.shape[1]
    S_trg = target_ids.shape[1]
    pe = params["pos_enc"]

    # embedding + positional encoding (dropout is identity in eval mode).
    # TODO(synk): embedding gather stays in plain JAX (no clean Pallas equivalent).
    src = params["src_emb"][source_ids] + pe[:S_src, :]
    trg = params["trg_emb"][target_ids] + pe[:S_trg, :]

    # encoder
    enc = src
    for lp in params["encoder"]:
        enc = encoder_block(lp, enc, n_heads, hidden_dim)

    # decoder with causal mask as an additive bias (-1e20 above the diagonal)
    mask = jnp.triu(jnp.ones((S_trg, S_trg), jnp.float32), k=1)
    mask_bias = mask * jnp.float32(-1e20)
    dec = trg
    for lp in params["decoder"]:
        dec = decoder_block(lp, dec, enc, mask_bias, n_heads, hidden_dim)

    # final vocab projection
    return linear_pallas(dec, params["vocab_w"], params["vocab_b"],
                         out_dtype=jnp.float32)


# ----------------------------------------------------------------------------
# Deterministic parameter initialization (weights stored bf16, biases/LN f32)
# ----------------------------------------------------------------------------
def init_params(key, src_vocab, trg_vocab, max_len, hidden_dim, n_heads, n_stack):
    d_model = hidden_dim * n_heads
    ctr = [0]

    def nk():
        ctr[0] += 1
        return jax.random.fold_in(key, ctr[0])

    def w(shape, scale=0.02):
        return (scale * jax.random.normal(nk(), shape)).astype(jnp.float32)

    def bf(x):
        return x.astype(jnp.bfloat16)

    def mha_self_p():
        wq, wk, wv = (w((d_model, d_model)) for _ in range(3))
        return {
            "wqkv": bf(jnp.concatenate([wq, wk, wv], axis=1)),   # fused once
            "wo": bf(w((d_model, d_model))),
            "ln_g": jnp.ones((d_model,), jnp.float32),
            "ln_b": jnp.zeros((d_model,), jnp.float32),
        }

    def mha_cross_p():
        wq, wk = (w((d_model, d_model)) for _ in range(2))
        return {
            "wqk": bf(jnp.concatenate([wq, wk], axis=1)),         # fused once
            "wv": bf(w((d_model, d_model))),
            "wo": bf(w((d_model, d_model))),
            "ln_g": jnp.ones((d_model,), jnp.float32),
            "ln_b": jnp.zeros((d_model,), jnp.float32),
        }

    def ffn_p():
        return {
            "w1": bf(w((d_model, 4 * d_model))),
            "b1": jnp.zeros((4 * d_model,), jnp.float32),
            "w2": bf(w((4 * d_model, d_model))),
            "b2": jnp.zeros((d_model,), jnp.float32),
            "ln_g": jnp.ones((d_model,), jnp.float32),
            "ln_b": jnp.zeros((d_model,), jnp.float32),
        }

    params = {
        "src_emb": w((src_vocab, d_model), 1.0),
        "trg_emb": w((trg_vocab, d_model), 1.0),
        "pos_enc": positional_encoding(max_len, d_model),
        "encoder": [{"mha": mha_self_p(), "ffn": ffn_p()} for _ in range(n_stack)],
        "decoder": [{"mha1": mha_self_p(), "mha2": mha_cross_p(), "ffn": ffn_p()}
                    for _ in range(n_stack)],
        "vocab_w": bf(w((d_model, trg_vocab))),
        "vocab_b": jnp.zeros((trg_vocab,), jnp.float32),
    }
    return params


# ----------------------------------------------------------------------------
if __name__ == "__main__":
    # Small config: d_model = hidden_dim * n_heads = 8 * 4 = 32
    src_vocab_size, trg_vocab_size = 50, 60
    max_len, hidden_dim, n_heads, n_stack = 64, 8, 4, 2
    batch, seq = 2, 8

    key = jax.random.PRNGKey(0)
    kp, ks, kt = jax.random.split(key, 3)

    params = init_params(kp, src_vocab_size, trg_vocab_size, max_len,
                         hidden_dim, n_heads, n_stack)
    source = jax.random.randint(ks, (batch, seq), 0, src_vocab_size, dtype=jnp.int32)
    target = jax.random.randint(kt, (batch, seq), 0, trg_vocab_size, dtype=jnp.int32)

    fwd = jax.jit(functools.partial(transformer_forward,
                                    n_heads=n_heads, hidden_dim=hidden_dim))
    out = fwd(params, source, target)
    out = jax.block_until_ready(out)

    assert out.shape == (batch, seq, trg_vocab_size), out.shape
    assert jnp.all(jnp.isfinite(out))
    print("KERNEL_OK")
</pallas_src>

<mosaic_0001>
module attributes {stable_mosaic.version = 11 : i64} {
  func.func @_matmul_bias_kernel(%arg0: i32, %arg1: i32, %arg2: memref<16x32xf32, #tpu.memory_space<vmem>>, %arg3: memref<32x96xbf16, #tpu.memory_space<vmem>>, %arg4: memref<1x96xf32, #tpu.memory_space<vmem>>, %arg5: memref<16x96xbf16, #tpu.memory_space<vmem>>) attributes {dimension_semantics = [#tpu.dimension_semantics<parallel>, #tpu.dimension_semantics<parallel>], iteration_bounds = array<i64: 1, 1>, scalar_prefetch = 0 : i64, scratch_operands = 0 : i64, tpu.core_type = #tpu.core_type<tc>, window_params = [{transform_indices = @transform_0, window_bounds = array<i64: 16, 32>}, {transform_indices = @transform_1, window_bounds = array<i64: 32, 96>}, {transform_indices = @transform_2, window_bounds = array<i64: 1, 96>}, {transform_indices = @transform_3, window_bounds = array<i64: 16, 96>}]} {
    %c0 = arith.constant 0 : index
    %c0_0 = arith.constant 0 : index
    %0 = vector.load %arg2[%c0, %c0_0] : memref<16x32xf32, #tpu.memory_space<vmem>>, vector<16x32xf32>
    %1 = arith.truncf %0 : vector<16x32xf32> to vector<16x32xbf16>
    %c0_1 = arith.constant 0 : index
    %c0_2 = arith.constant 0 : index
    %2 = vector.load %arg3[%c0_1, %c0_2] : memref<32x96xbf16, #tpu.memory_space<vmem>>, vector<32x96xbf16>
    %cst = arith.constant dense<0.000000e+00> : vector<16x96xf32>
    %3 = tpu.matmul %1, %2, %cst {dimension_numbers = #tpu.dot_dimension_numbers<[1], [0], [0], [1], [0, 0, 1, 1], [], []>} : vector<16x32xbf16>, vector<32x96xbf16>, vector<16x96xf32> -> vector<16x96xf32>
    %c0_3 = arith.constant 0 : index
    %c0_4 = arith.constant 0 : index
    %4 = vector.load %arg4[%c0_3, %c0_4] : memref<1x96xf32, #tpu.memory_space<vmem>>, vector<1x96xf32>
    %5 = vector.broadcast %4 : vector<1x96xf32> to vector<16x96xf32>
    %6 = arith.addf %3, %5 : vector<16x96xf32>
    %7 = arith.truncf %6 : vector<16x96xf32> to vector<16x96xbf16>
    %c0_5 = arith.constant 0 : index
    %c0_6 = arith.constant 0 : index
    %8 = vector.load %arg5[%c0_5, %c0_6] : memref<16x96xbf16, #tpu.memory_space<vmem>>, vector<16x96xbf16>
    tpu.vector_store %arg5[%c0_5, %c0_6], %7 {strides = array<i32>} : memref<16x96xbf16, #tpu.memory_space<vmem>>, vector<16x96xbf16>,
    return
  }
  func.func @transform_0(%arg0: i32, %arg1: i32) -> (i32, i32) {
    %c0_i32 = arith.constant 0 : i32
    %c0_i32_0 = arith.constant 0 : i32
    return %arg0, %c0_i32 : i32, i32
  }
  func.func @transform_1(%arg0: i32, %arg1: i32) -> (i32, i32) {
    %c0_i32 = arith.constant 0 : i32
    %c0_i32_0 = arith.constant 0 : i32
    return %c0_i32, %arg1 : i32, i32
  }
  func.func @transform_2(%arg0: i32, %arg1: i32) -> (i32, i32) {
    %c0_i32 = arith.constant 0 : i32
    %c0_i32_0 = arith.constant 0 : i32
    return %c0_i32, %arg1 : i32, i32
  }
  func.func @transform_3(%arg0: i32, %arg1: i32) -> (i32, i32) {
    %c0_i32 = arith.constant 0 : i32
    return %arg0, %arg1 : i32, i32
  }
}

module attributes {stable_mosaic.version = 11 : i64} {
  func.func @_flash_attention_kernel(%arg0: i32, %arg1: i32, %arg2: i32, %arg3: memref<1x8x8xbf16, #tpu.memory_space<vmem>>, %arg4: memref<1x8x8xbf16, #tpu.memory_space<vmem>>, %arg5: memref<1x8x8xbf16, #tpu.memory_space<vmem>>, %arg6: memref<8x8xf32, #tpu.memory_space<vmem>>, %arg7: memref<1x8x8xbf16, #tpu.memory_space<vmem>>, %arg8: memref<8x1xf32, #tpu.memory_space<vmem>>, %arg9: memref<8x1xf32, #tpu.memory_space<vmem>>, %arg10: memref<8x8xf32, #tpu.memory_space<vmem>>) attributes {dimension_semantics = [#tpu.dimension_semantics<parallel>, #tpu.dimension_semantics<parallel>, #tpu.dimension_semantics<arbitrary>], iteration_bounds = array<i64: 8, 1, 1>, scalar_prefetch = 0 : i64, scratch_operands = 3 : i64, tpu.core_type = #tpu.core_type<tc>, window_params = [{transform_indices = @transform_0, window_bounds = array<i64: 1, 8, 8>}, {transform_indices = @transform_1, window_bounds = array<i64: 1, 8, 8>}, {transform_indices = @transform_2, window_bounds = array<i64: 1, 8, 8>}, {transform_indices = @transform_3, window_bounds = array<i64: 8, 8>}, {transform_indices = @transform_4, window_bounds = array<i64: 1, 8, 8>}]} {
    %c0_i32 = arith.constant 0 : i32
    %0 = arith.cmpi eq, %arg2, %c0_i32 : i32
    %1 = arith.extui %0 : i1 to i32
    %c0_i32_0 = arith.constant 0 : i32
    %2 = arith.cmpi ne, %1, %c0_i32_0 : i32
    scf.if %2 {
      %cst_29 = arith.constant 0xFF800000 : f32
      %42 = vector.broadcast %cst_29 : f32 to vector<8x1xf32>
      %c0_30 = arith.constant 0 : index
      %c0_31 = arith.constant 0 : index
      %43 = vector.load %arg8[%c0_30, %c0_31] : memref<8x1xf32, #tpu.memory_space<vmem>>, vector<8x1xf32>
      tpu.vector_store %arg8[%c0_30, %c0_31], %42 {strides = array<i32>} : memref<8x1xf32, #tpu.memory_space<vmem>>, vector<8x1xf32>,
      %cst_32 = arith.constant 0.000000e+00 : f32
      %44 = vector.broadcast %cst_32 : f32 to vector<8x1xf32>
      %c0_33 = arith.constant 0 : index
      %c0_34 = arith.constant 0 : index
      %45 = vector.load %arg9[%c0_33, %c0_34] : memref<8x1xf32, #tpu.memory_space<vmem>>, vector<8x1xf32>
      tpu.vector_store %arg9[%c0_33, %c0_34], %44 {strides = array<i32>} : memref<8x1xf32, #tpu.memory_space<vmem>>, vector<8x1xf32>,
      %cst_35 = arith.constant 0.000000e+00 : f32
      %46 = vector.broadcast %cst_35 : f32 to vector<8x8xf32>
      %c0_36 = arith.constant 0 : index
      %c0_37 = arith.constant 0 : index
      %47 = vector.load %arg10[%c0_36, %c0_37] : memref<8x8xf32, #tpu.memory_space<vmem>>, vector<8x8xf32>
      tpu.vector_store %arg10[%c0_36, %c0_37], %46 {strides = array<i32>} : memref<8x8xf32, #tpu.memory_space<vmem>>, vector<8x8xf32>,
    } else {
    }
    %c0 = arith.constant 0 : index
    %c0_1 = arith.constant 0 : index
    %c0_2 = arith.constant 0 : index
    %3 = vector.load %arg3[%c0, %c0_1, %c0_2] : memref<1x8x8xbf16, #tpu.memory_space<vmem>>, vector<1x8x8xbf16>
    %4 = vector.shape_cast %3 : vector<1x8x8xbf16> to vector<8x8xbf16>
    %5 = arith.extf %4 : vector<8x8xbf16> to vector<8x8xf32>
    %cst = arith.constant 0.353553385 : f32
    %6 = vector.broadcast %cst : f32 to vector<8x8xf32>
    %7 = arith.mulf %5, %6 : vector<8x8xf32>
    %8 = arith.truncf %7 : vector<8x8xf32> to vector<8x8xbf16>
    %c0_3 = arith.constant 0 : index
    %c0_4 = arith.constant 0 : index
    %c0_5 = arith.constant 0 : index
    %9 = vector.load %arg4[%c0_3, %c0_4, %c0_5] : memref<1x8x8xbf16, #tpu.memory_space<vmem>>, vector<1x8x8xbf16>
    %10 = vector.shape_cast %9 : vector<1x8x8xbf16> to vector<8x8xbf16>
    %c0_6 = arith.constant 0 : index
    %c0_7 = arith.constant 0 : index
    %c0_8 = arith.constant 0 : index
    %11 = vector.load %arg5[%c0_6, %c0_7, %c0_8] : memref<1x8x8xbf16, #tpu.memory_space<vmem>>, vector<1x8x8xbf16>
    %12 = vector.shape_cast %11 : vector<1x8x8xbf16> to vector<8x8xbf16>
    %cst_9 = arith.constant dense<0.000000e+00> : vector<8x8xf32>
    %13 = tpu.matmul %8, %10, %cst_9 {dimension_numbers = #tpu.dot_dimension_numbers<[1], [1], [0], [0], [0, 0, 1, 0], [], []>} : vector<8x8xbf16>, vector<8x8xbf16>, vector<8x8xf32> -> vector<8x8xf32>
    %c0_10 = arith.constant 0 : index
    %c0_11 = arith.constant 0 : index
    %14 = vector.load %arg6[%c0_10, %c0_11] : memref<8x8xf32, #tpu.memory_space<vmem>>, vector<8x8xf32>
    %15 = arith.addf %13, %14 : vector<8x8xf32>
    %c0_12 = arith.constant 0 : index
    %c0_13 = arith.constant 0 : index
    %16 = vector.load %arg8[%c0_12, %c0_13] : memref<8x1xf32, #tpu.memory_space<vmem>>, vector<8x1xf32>
    %cst_14 = arith.constant dense<0xFF800000> : vector<8xf32>
    %17 = vector.multi_reduction <maximumf>, %15, %cst_14 [1] : vector<8x8xf32> to vector<8xf32>
    %18 = vector.shape_cast %17 : vector<8xf32> to vector<8x1xf32>
    %19 = arith.maximumf %16, %18 : vector<8x1xf32>
    %20 = arith.subf %16, %19 : vector<8x1xf32>
    %21 = math.exp %20 : vector<8x1xf32>
    %22 = vector.broadcast %19 : vector<8x1xf32> to vector<8x8xf32>
    %23 = arith.subf %15, %22 : vector<8x8xf32>
    %24 = math.exp %23 : vector<8x8xf32>
    %c0_15 = arith.constant 0 : index
    %c0_16 = arith.constant 0 : index
    %25 = vector.load %arg9[%c0_15, %c0_16] : memref<8x1xf32, #tpu.memory_space<vmem>>, vector<8x1xf32>
    %26 = arith.mulf %21, %25 : vector<8x1xf32>
    %cst_17 = arith.constant dense<0.000000e+00> : vector<8xf32>
    %27 = vector.multi_reduction <add>, %24, %cst_17 [1] : vector<8x8xf32> to vector<8xf32>
    %28 = vector.shape_cast %27 : vector<8xf32> to vector<8x1xf32>
    %29 = arith.addf %26, %28 : vector<8x1xf32>
    %c0_18 = arith.constant 0 : index
    %c0_19 = arith.constant 0 : index
    %30 = vector.load %arg9[%c0_18, %c0_19] : memref<8x1xf32, #tpu.memory_space<vmem>>, vector<8x1xf32>
    tpu.vector_store %arg9[%c0_18, %c0_19], %29 {strides = array<i32>} : memref<8x1xf32, #tpu.memory_space<vmem>>, vector<8x1xf32>,
    %c0_20 = arith.constant 0 : index
    %c0_21 = arith.constant 0 : index
    %31 = vector.load %arg10[%c0_20, %c0_21] : memref<8x8xf32, #tpu.memory_space<vmem>>, vector<8x8xf32>
    %32 = vector.broadcast %21 : vector<8x1xf32> to vector<8x8xf32>
    %33 = arith.mulf %32, %31 : vector<8x8xf32>
    %34 = arith.truncf %24 : vector<8x8xf32> to vector<8x8xbf16>
    %cst_22 = arith.constant dense<0.000000e+00> : vector<8x8xf32>
    %35 = tpu.matmul %34, %12, %cst_22 {dimension_numbers = #tpu.dot_dimension_numbers<[1], [0], [0], [1], [0, 0, 1, 1], [], []>} : vector<8x8xbf16>, vector<8x8xbf16>, vector<8x8xf32> -> vector<8x8xf32>
    %36 = arith.addf %33, %35 : vector<8x8xf32>
    %c0_23 = arith.constant 0 : index
    %c0_24 = arith.constant 0 : index
    %37 = vector.load %arg10[%c0_23, %c0_24] : memref<8x8xf32, #tpu.memory_space<vmem>>, vector<8x8xf32>
    tpu.vector_store %arg10[%c0_23, %c0_24], %36 {strides = array<i32>} : memref<8x8xf32, #tpu.memory_space<vmem>>, vector<8x8xf32>,
    %c0_25 = arith.constant 0 : index
    %c0_26 = arith.constant 0 : index
    %38 = vector.load %arg8[%c0_25, %c0_26] : memref<8x1xf32, #tpu.memory_space<vmem>>, vector<8x1xf32>
    tpu.vector_store %arg8[%c0_25, %c0_26], %19 {strides = array<i32>} : memref<8x1xf32, #tpu.memory_space<vmem>>, vector<8x1xf32>,
    %c0_i32_27 = arith.constant 0 : i32
    %39 = arith.cmpi eq, %arg2, %c0_i32_27 : i32
    %40 = arith.extui %39 : i1 to i32
    %c0_i32_28 = arith.constant 0 : i32
    %41 = arith.cmpi ne, %40, %c0_i32_28 : i32
    scf.if %41 {
      %c0_29 = arith.constant 0 : index
      %c0_30 = arith.constant 0 : index
      %42 = vector.load %arg10[%c0_29, %c0_30] : memref<8x8xf32, #tpu.memory_space<vmem>>, vector<8x8xf32>
      %c0_31 = arith.constant 0 : index
      %c0_32 = arith.constant 0 : index
      %43 = vector.load %arg9[%c0_31, %c0_32] : memref<8x1xf32, #tpu.memory_space<vmem>>, vector<8x1xf32>
      %44 = tpu.reciprocal %43 {approx = true} : vector<8x1xf32> -> vector<8x1xf32>
      %45 = vector.broadcast %44 : vector<8x1xf32> to vector<8x8xf32>
      %46 = arith.mulf %42, %45 : vector<8x8xf32>
      %47 = arith.truncf %46 : vector<8x8xf32> to vector<8x8xbf16>
      %c0_33 = arith.constant 0 : index
      %c0_34 = arith.constant 0 : index
      %c0_35 = arith.constant 0 : index
      %48 = vector.load %arg7[%c0_33, %c0_34, %c0_35] : memref<1x8x8xbf16, #tpu.memory_space<vmem>>, vector<1x8x8xbf16>
      %49 = vector.shape_cast %48 : vector<1x8x8xbf16> to vector<8x8xbf16>
      %50 = vector.shape_cast %47 : vector<8x8xbf16> to vector<1x8x8xbf16>
      tpu.vector_store %arg7[%c0_33, %c0_34, %c0_35], %50 {strides = array<i32>} : memref<1x8x8xbf16, #tpu.memory_space<vmem>>, vector<1x8x8xbf16>,
    } else {
    }
    return
  }
  func.func @transform_0(%arg0: i32, %arg1: i32, %arg2: i32) -> (i32, i32, i32) {
    %c0_i32 = arith.constant 0 : i32
    %c0_i32_0 = arith.constant 0 : i32
    return %arg0, %arg1, %c0_i32 : i32, i32, i32
  }
  func.func @transform_1(%arg0: i32, %arg1: i32, %arg2: i32) -> (i32, i32, i32) {
    %c0_i32 = arith.constant 0 : i32
    %c0_i32_0 = arith.constant 0 : i32
    return %arg0, %arg2, %c0_i32 : i32, i32, i32
  }
  func.func @transform_2(%arg0: i32, %arg1: i32, %arg2: i32) -> (i32, i32, i32) {
    %c0_i32 = arith.constant 0 : i32
    %c0_i32_0 = arith.constant 0 : i32
    return %arg0, %arg2, %c0_i32 : i32, i32, i32
  }
  func.func @transform_3(%arg0: i32, %arg1: i32, %arg2: i32) -> (i32, i32) {
    %c0_i32 = arith.constant 0 : i32
    return %arg1, %arg2 : i32, i32
  }
  func.func @transform_4(%arg0: i32, %arg1: i32, %arg2: i32) -> (i32, i32, i32) {
    %c0_i32 = arith.constant 0 : i32
    %c0_i32_0 = arith.constant 0 : i32
    return %arg0, %arg1, %c0_i32 : i32, i32, i32
  }
}

module attributes {stable_mosaic.version = 11 : i64} {
  func.func @_proj_add_ln_kernel(%arg0: i32, %arg1: memref<16x32xbf16, #tpu.memory_space<vmem>>, %arg2: memref<32x32xbf16, #tpu.memory_space<vmem>>, %arg3: memref<16x32xf32, #tpu.memory_space<vmem>>, %arg4: memref<1x32xf32, #tpu.memory_space<vmem>>, %arg5: memref<1x32xf32, #tpu.memory_space<vmem>>, %arg6: memref<16x32xf32, #tpu.memory_space<vmem>>) attributes {dimension_semantics = [#tpu.dimension_semantics<parallel>], iteration_bounds = array<i64: 1>, scalar_prefetch = 0 : i64, scratch_operands = 0 : i64, tpu.core_type = #tpu.core_type<tc>, window_params = [{transform_indices = @transform_0, window_bounds = array<i64: 16, 32>}, {pipeline_mode = #tpu.pipeline_mode<synchronous>, transform_indices = @transform_1, window_bounds = array<i64: 32, 32>}, {transform_indices = @transform_2, window_bounds = array<i64: 16, 32>}, {pipeline_mode = #tpu.pipeline_mode<synchronous>, transform_indices = @transform_3, window_bounds = array<i64: 1, 32>}, {pipeline_mode = #tpu.pipeline_mode<synchronous>, transform_indices = @transform_4, window_bounds = array<i64: 1, 32>}, {transform_indices = @transform_5, window_bounds = array<i64: 16, 32>}]} {
    %c0 = arith.constant 0 : index
    %c0_0 = arith.constant 0 : index
    %0 = vector.load %arg1[%c0, %c0_0] : memref<16x32xbf16, #tpu.memory_space<vmem>>, vector<16x32xbf16>
    %c0_1 = arith.constant 0 : index
    %c0_2 = arith.constant 0 : index
    %1 = vector.load %arg2[%c0_1, %c0_2] : memref<32x32xbf16, #tpu.memory_space<vmem>>, vector<32x32xbf16>
    %cst = arith.constant dense<0.000000e+00> : vector<16x32xf32>
    %2 = tpu.matmul %0, %1, %cst {dimension_numbers = #tpu.dot_dimension_numbers<[1], [0], [0], [1], [0, 0, 1, 1], [], []>} : vector<16x32xbf16>, vector<32x32xbf16>, vector<16x32xf32> -> vector<16x32xf32>
    %c0_3 = arith.constant 0 : index
    %c0_4 = arith.constant 0 : index
    %3 = vector.load %arg3[%c0_3, %c0_4] : memref<16x32xf32, #tpu.memory_space<vmem>>, vector<16x32xf32>
    %4 = arith.addf %2, %3 : vector<16x32xf32>
    %cst_5 = arith.constant dense<0.000000e+00> : vector<16xf32>
    %5 = vector.multi_reduction <add>, %4, %cst_5 [1] : vector<16x32xf32> to vector<16xf32>
    %6 = vector.shape_cast %5 : vector<16xf32> to vector<16x1xf32>
    %cst_6 = arith.constant 3.200000e+01 : f32
    %7 = vector.broadcast %cst_6 : f32 to vector<16x1xf32>
    %8 = arith.divf %6, %7 : vector<16x1xf32>
    %9 = vector.broadcast %8 : vector<16x1xf32> to vector<16x32xf32>
    %10 = arith.subf %4, %9 : vector<16x32xf32>
    %11 = arith.mulf %10, %10 : vector<16x32xf32>
    %cst_7 = arith.constant dense<0.000000e+00> : vector<16xf32>
    %12 = vector.multi_reduction <add>, %11, %cst_7 [1] : vector<16x32xf32> to vector<16xf32>
    %13 = vector.shape_cast %12 : vector<16xf32> to vector<16x1xf32>
    %cst_8 = arith.constant 3.200000e+01 : f32
    %14 = vector.broadcast %cst_8 : f32 to vector<16x1xf32>
    %15 = arith.divf %13, %14 : vector<16x1xf32>
    %16 = vector.broadcast %8 : vector<16x1xf32> to vector<16x32xf32>
    %17 = arith.subf %4, %16 : vector<16x32xf32>
    %cst_9 = arith.constant 9.99999974E-6 : f32
    %18 = vector.broadcast %cst_9 : f32 to vector<16x1xf32>
    %19 = arith.addf %15, %18 : vector<16x1xf32>
    %20 = math.rsqrt %19 : vector<16x1xf32>
    %21 = vector.broadcast %20 : vector<16x1xf32> to vector<16x32xf32>
    %22 = arith.mulf %17, %21 : vector<16x32xf32>
    %c0_10 = arith.constant 0 : index
    %c0_11 = arith.constant 0 : index
    %23 = vector.load %arg4[%c0_10, %c0_11] : memref<1x32xf32, #tpu.memory_space<vmem>>, vector<1x32xf32>
    %24 = vector.broadcast %23 : vector<1x32xf32> to vector<16x32xf32>
    %25 = arith.mulf %22, %24 : vector<16x32xf32>
    %c0_12 = arith.constant 0 : index
    %c0_13 = arith.constant 0 : index
    %26 = vector.load %arg5[%c0_12, %c0_13] : memref<1x32xf32, #tpu.memory_space<vmem>>, vector<1x32xf32>
    %27 = vector.broadcast %26 : vector<1x32xf32> to vector<16x32xf32>
    %28 = arith.addf %25, %27 : vector<16x32xf32>
    %c0_14 = arith.constant 0 : index
    %c0_15 = arith.constant 0 : index
    %29 = vector.load %arg6[%c0_14, %c0_15] : memref<16x32xf32, #tpu.memory_space<vmem>>, vector<16x32xf32>
    tpu.vector_store %arg6[%c0_14, %c0_15], %28 {strides = array<i32>} : memref<16x32xf32, #tpu.memory_space<vmem>>, vector<16x32xf32>,
    return
  }
  func.func @transform_0(%arg0: i32) -> (i32, i32) {
    %c0_i32 = arith.constant 0 : i32
    %c0_i32_0 = arith.constant 0 : i32
    return %arg0, %c0_i32 : i32, i32
  }
  func.func @transform_1(%arg0: i32) -> (i32, i32) {
    %c0_i32 = arith.constant 0 : i32
    %c0_i32_0 = arith.constant 0 : i32
    %c0_i32_1 = arith.constant 0 : i32
    return %c0_i32, %c0_i32_0 : i32, i32
  }
  func.func @transform_2(%arg0: i32) -> (i32, i32) {
    %c0_i32 = arith.constant 0 : i32
    %c0_i32_0 = arith.constant 0 : i32
    return %arg0, %c0_i32 : i32, i32
  }
  func.func @transform_3(%arg0: i32) -> (i32, i32) {
    %c0_i32 = arith.constant 0 : i32
    %c0_i32_0 = arith.constant 0 : i32
    %c0_i32_1 = arith.constant 0 : i32
    return %c0_i32, %c0_i32_0 : i32, i32
  }
  func.func @transform_4(%arg0: i32) -> (i32, i32) {
    %c0_i32 = arith.constant 0 : i32
    %c0_i32_0 = arith.constant 0 : i32
    %c0_i32_1 = arith.constant 0 : i32
    return %c0_i32, %c0_i32_0 : i32, i32
  }
  func.func @transform_5(%arg0: i32) -> (i32, i32) {
    %c0_i32 = arith.constant 0 : i32
    %c0_i32_0 = arith.constant 0 : i32
    return %arg0, %c0_i32 : i32, i32
  }
}

module attributes {stable_mosaic.version = 11 : i64} {
  func.func @_ffn_ln_kernel(%arg0: i32, %arg1: i32, %arg2: memref<16x32xf32, #tpu.memory_space<vmem>>, %arg3: memref<32x128xbf16, #tpu.memory_space<vmem>>, %arg4: memref<1x128xf32, #tpu.memory_space<vmem>>, %arg5: memref<128x32xbf16, #tpu.memory_space<vmem>>, %arg6: memref<1x32xf32, #tpu.memory_space<vmem>>, %arg7: memref<1x32xf32, #tpu.memory_space<vmem>>, %arg8: memref<1x32xf32, #tpu.memory_space<vmem>>, %arg9: memref<16x32xf32, #tpu.memory_space<vmem>>, %arg10: memref<16x32xf32, #tpu.memory_space<vmem>>) attributes {dimension_semantics = [#tpu.dimension_semantics<parallel>, #tpu.dimension_semantics<arbitrary>], iteration_bounds = array<i64: 1, 1>, scalar_prefetch = 0 : i64, scratch_operands = 1 : i64, tpu.core_type = #tpu.core_type<tc>, window_params = [{transform_indices = @transform_0, window_bounds = array<i64: 16, 32>}, {transform_indices = @transform_1, window_bounds = array<i64: 32, 128>}, {transform_indices = @transform_2, window_bounds = array<i64: 1, 128>}, {transform_indices = @transform_3, window_bounds = array<i64: 128, 32>}, {pipeline_mode = #tpu.pipeline_mode<synchronous>, transform_indices = @transform_4, window_bounds = array<i64: 1, 32>}, {pipeline_mode = #tpu.pipeline_mode<synchronous>, transform_indices = @transform_5, window_bounds = array<i64: 1, 32>}, {pipeline_mode = #tpu.pipeline_mode<synchronous>, transform_indices = @transform_6, window_bounds = array<i64: 1, 32>}, {transform_indices = @transform_7, window_bounds = array<i64: 16, 32>}]} {
    %c0_i32 = arith.constant 0 : i32
    %0 = arith.cmpi eq, %arg1, %c0_i32 : i32
    %1 = arith.extui %0 : i1 to i32
    %c0_i32_0 = arith.constant 0 : i32
    %2 = arith.cmpi ne, %1, %c0_i32_0 : i32
    scf.if %2 {
      %cst_16 = arith.constant 0.000000e+00 : f32
      %21 = vector.broadcast %cst_16 : f32 to vector<16x32xf32>
      %c0_17 = arith.constant 0 : index
      %c0_18 = arith.constant 0 : index
      %22 = vector.load %arg10[%c0_17, %c0_18] : memref<16x32xf32, #tpu.memory_space<vmem>>, vector<16x32xf32>
      tpu.vector_store %arg10[%c0_17, %c0_18], %21 {strides = array<i32>} : memref<16x32xf32, #tpu.memory_space<vmem>>, vector<16x32xf32>,
    } else {
    }
    %c0 = arith.constant 0 : index
    %c0_1 = arith.constant 0 : index
    %3 = vector.load %arg2[%c0, %c0_1] : memref<16x32xf32, #tpu.memory_space<vmem>>, vector<16x32xf32>
    %4 = arith.truncf %3 : vector<16x32xf32> to vector<16x32xbf16>
    %c0_2 = arith.constant 0 : index
    %c0_3 = arith.constant 0 : index
    %5 = vector.load %arg3[%c0_2, %c0_3] : memref<32x128xbf16, #tpu.memory_space<vmem>>, vector<32x128xbf16>
    %cst = arith.constant dense<0.000000e+00> : vector<16x128xf32>
    %6 = tpu.matmul %4, %5, %cst {dimension_numbers = #tpu.dot_dimension_numbers<[1], [0], [0], [1], [0, 0, 1, 1], [], []>} : vector<16x32xbf16>, vector<32x128xbf16>, vector<16x128xf32> -> vector<16x128xf32>
    %c0_4 = arith.constant 0 : index
    %c0_5 = arith.constant 0 : index
    %7 = vector.load %arg4[%c0_4, %c0_5] : memref<1x128xf32, #tpu.memory_space<vmem>>, vector<1x128xf32>
    %8 = vector.broadcast %7 : vector<1x128xf32> to vector<16x128xf32>
    %9 = arith.addf %6, %8 : vector<16x128xf32>
    %cst_6 = arith.constant 0.000000e+00 : f32
    %10 = vector.broadcast %cst_6 : f32 to vector<16x128xf32>
    %11 = arith.maximumf %9, %10 : vector<16x128xf32>
    %c0_7 = arith.constant 0 : index
    %c0_8 = arith.constant 0 : index
    %12 = vector.load %arg10[%c0_7, %c0_8] : memref<16x32xf32, #tpu.memory_space<vmem>>, vector<16x32xf32>
    %13 = arith.truncf %11 : vector<16x128xf32> to vector<16x128xbf16>
    %c0_9 = arith.constant 0 : index
    %c0_10 = arith.constant 0 : index
    %14 = vector.load %arg5[%c0_9, %c0_10] : memref<128x32xbf16, #tpu.memory_space<vmem>>, vector<128x32xbf16>
    %cst_11 = arith.constant dense<0.000000e+00> : vector<16x32xf32>
    %15 = tpu.matmul %13, %14, %cst_11 {dimension_numbers = #tpu.dot_dimension_numbers<[1], [0], [0], [1], [0, 0, 1, 1], [], []>} : vector<16x128xbf16>, vector<128x32xbf16>, vector<16x32xf32> -> vector<16x32xf32>
    %16 = arith.addf %12, %15 : vector<16x32xf32>
    %c0_12 = arith.constant 0 : index
    %c0_13 = arith.constant 0 : index
    %17 = vector.load %arg10[%c0_12, %c0_13] : memref<16x32xf32, #tpu.memory_space<vmem>>, vector<16x32xf32>
    tpu.vector_store %arg10[%c0_12, %c0_13], %16 {strides = array<i32>} : memref<16x32xf32, #tpu.memory_space<vmem>>, vector<16x32xf32>,
    %c0_i32_14 = arith.constant 0 : i32
    %18 = arith.cmpi eq, %arg1, %c0_i32_14 : i32
    %19 = arith.extui %18 : i1 to i32
    %c0_i32_15 = arith.constant 0 : i32
    %20 = arith.cmpi ne, %19, %c0_i32_15 : i32
    scf.if %20 {
      %c0_16 = arith.constant 0 : index
      %c0_17 = arith.constant 0 : index
      %21 = vector.load %arg2[%c0_16, %c0_17] : memref<16x32xf32, #tpu.memory_space<vmem>>, vector<16x32xf32>
      %c0_18 = arith.constant 0 : index
      %c0_19 = arith.constant 0 : index
      %22 = vector.load %arg10[%c0_18, %c0_19] : memref<16x32xf32, #tpu.memory_space<vmem>>, vector<16x32xf32>
      %23 = arith.addf %21, %22 : vector<16x32xf32>
      %c0_20 = arith.constant 0 : index
      %c0_21 = arith.constant 0 : index
      %24 = vector.load %arg6[%c0_20, %c0_21] : memref<1x32xf32, #tpu.memory_space<vmem>>, vector<1x32xf32>
      %25 = vector.broadcast %24 : vector<1x32xf32> to vector<16x32xf32>
      %26 = arith.addf %23, %25 : vector<16x32xf32>
      %cst_22 = arith.constant dense<0.000000e+00> : vector<16xf32>
      %27 = vector.multi_reduction <add>, %26, %cst_22 [1] : vector<16x32xf32> to vector<16xf32>
      %28 = vector.shape_cast %27 : vector<16xf32> to vector<16x1xf32>
      %cst_23 = arith.constant 3.200000e+01 : f32
      %29 = vector.broadcast %cst_23 : f32 to vector<16x1xf32>
      %30 = arith.divf %28, %29 : vector<16x1xf32>
      %31 = vector.broadcast %30 : vector<16x1xf32> to vector<16x32xf32>
      %32 = arith.subf %26, %31 : vector<16x32xf32>
      %33 = arith.mulf %32, %32 : vector<16x32xf32>
      %cst_24 = arith.constant dense<0.000000e+00> : vector<16xf32>
      %34 = vector.multi_reduction <add>, %33, %cst_24 [1] : vector<16x32xf32> to vector<16xf32>
      %35 = vector.shape_cast %34 : vector<16xf32> to vector<16x1xf32>
      %cst_25 = arith.constant 3.200000e+01 : f32
      %36 = vector.broadcast %cst_25 : f32 to vector<16x1xf32>
      %37 = arith.divf %35, %36 : vector<16x1xf32>
      %38 = vector.broadcast %30 : vector<16x1xf32> to vector<16x32xf32>
      %39 = arith.subf %26, %38 : vector<16x32xf32>
      %cst_26 = arith.constant 9.99999974E-6 : f32
      %40 = vector.broadcast %cst_26 : f32 to vector<16x1xf32>
      %41 = arith.addf %37, %40 : vector<16x1xf32>
      %42 = math.rsqrt %41 : vector<16x1xf32>
      %43 = vector.broadcast %42 : vector<16x1xf32> to vector<16x32xf32>
      %44 = arith.mulf %39, %43 : vector<16x32xf32>
      %c0_27 = arith.constant 0 : index
      %c0_28 = arith.constant 0 : index
      %45 = vector.load %arg7[%c0_27, %c0_28] : memref<1x32xf32, #tpu.memory_space<vmem>>, vector<1x32xf32>
      %46 = vector.broadcast %45 : vector<1x32xf32> to vector<16x32xf32>
      %47 = arith.mulf %44, %46 : vector<16x32xf32>
      %c0_29 = arith.constant 0 : index
      %c0_30 = arith.constant 0 : index
      %48 = vector.load %arg8[%c0_29, %c0_30] : memref<1x32xf32, #tpu.memory_space<vmem>>, vector<1x32xf32>
      %49 = vector.broadcast %48 : vector<1x32xf32> to vector<16x32xf32>
      %50 = arith.addf %47, %49 : vector<16x32xf32>
      %c0_31 = arith.constant 0 : index
      %c0_32 = arith.constant 0 : index
      %51 = vector.load %arg9[%c0_31, %c0_32] : memref<16x32xf32, #tpu.memory_space<vmem>>, vector<16x32xf32>
      tpu.vector_store %arg9[%c0_31, %c0_32], %50 {strides = array<i32>} : memref<16x32xf32, #tpu.memory_space<vmem>>, vector<16x32xf32>,
    } else {
    }
    return
  }
  func.func @transform_0(%arg0: i32, %arg1: i32) -> (i32, i32) {
    %c0_i32 = arith.constant 0 : i32
    %c0_i32_0 = arith.constant 0 : i32
    return %arg0, %c0_i32 : i32, i32
  }
  func.func @transform_1(%arg0: i32, %arg1: i32) -> (i32, i32) {
    %c0_i32 = arith.constant 0 : i32
    %c0_i32_0 = arith.constant 0 : i32
    return %c0_i32, %arg1 : i32, i32
  }
  func.func @transform_2(%arg0: i32, %arg1: i32) -> (i32, i32) {
    %c0_i32 = arith.constant 0 : i32
    %c0_i32_0 = arith.constant 0 : i32
    return %c0_i32, %arg1 : i32, i32
  }
  func.func @transform_3(%arg0: i32, %arg1: i32) -> (i32, i32) {
    %c0_i32 = arith.constant 0 : i32
    %c0_i32_0 = arith.constant 0 : i32
    return %arg1, %c0_i32 : i32, i32
  }
  func.func @transform_4(%arg0: i32, %arg1: i32) -> (i32, i32) {
    %c0_i32 = arith.constant 0 : i32
    %c0_i32_0 = arith.constant 0 : i32
    %c0_i32_1 = arith.constant 0 : i32
    return %c0_i32, %c0_i32_0 : i32, i32
  }
  func.func @transform_5(%arg0: i32, %arg1: i32) -> (i32, i32) {
    %c0_i32 = arith.constant 0 : i32
    %c0_i32_0 = arith.constant 0 : i32
    %c0_i32_1 = arith.constant 0 : i32
    return %c0_i32, %c0_i32_0 : i32, i32
  }
  func.func @transform_6(%arg0: i32, %arg1: i32) -> (i32, i32) {
    %c0_i32 = arith.constant 0 : i32
    %c0_i32_0 = arith.constant 0 : i32
    %c0_i32_1 = arith.constant 0 : i32
    return %c0_i32, %c0_i32_0 : i32, i32
  }
  func.func @transform_7(%arg0: i32, %arg1: i32) -> (i32, i32) {
    %c0_i32 = arith.constant 0 : i32
    %c0_i32_0 = arith.constant 0 : i32
    return %arg0, %c0_i32 : i32, i32
  }
}

module attributes {stable_mosaic.version = 11 : i64} {
  func.func @_matmul_bias_kernel(%arg0: i32, %arg1: i32, %arg2: memref<16x32xf32, #tpu.memory_space<vmem>>, %arg3: memref<32x64xbf16, #tpu.memory_space<vmem>>, %arg4: memref<1x64xf32, #tpu.memory_space<vmem>>, %arg5: memref<16x64xbf16, #tpu.memory_space<vmem>>) attributes {dimension_semantics = [#tpu.dimension_semantics<parallel>, #tpu.dimension_semantics<parallel>], iteration_bounds = array<i64: 1, 1>, scalar_prefetch = 0 : i64, scratch_operands = 0 : i64, tpu.core_type = #tpu.core_type<tc>, window_params = [{transform_indices = @transform_0, window_bounds = array<i64: 16, 32>}, {transform_indices = @transform_1, window_bounds = array<i64: 32, 64>}, {transform_indices = @transform_2, window_bounds = array<i64: 1, 64>}, {transform_indices = @transform_3, window_bounds = array<i64: 16, 64>}]} {
    %c0 = arith.constant 0 : index
    %c0_0 = arith.constant 0 : index
    %0 = vector.load %arg2[%c0, %c0_0] : memref<16x32xf32, #tpu.memory_space<vmem>>, vector<16x32xf32>
    %1 = arith.truncf %0 : vector<16x32xf32> to vector<16x32xbf16>
    %c0_1 = arith.constant 0 : index
    %c0_2 = arith.constant 0 : index
    %2 = vector.load %arg3[%c0_1, %c0_2] : memref<32x64xbf16, #tpu.memory_space<vmem>>, vector<32x64xbf16>
    %cst = arith.constant dense<0.000000e+00> : vector<16x64xf32>
    %3 = tpu.matmul %1, %2, %cst {dimension_numbers = #tpu.dot_dimension_numbers<[1], [0], [0], [1], [0, 0, 1, 1], [], []>} : vector<16x32xbf16>, vector<32x64xbf16>, vector<16x64xf32> -> vector<16x64xf32>
    %c0_3 = arith.constant 0 : index
    %c0_4 = arith.constant 0 : index
    %4 = vector.load %arg4[%c0_3, %c0_4] : memref<1x64xf32, #tpu.memory_space<vmem>>, vector<1x64xf32>
    %5 = vector.broadcast %4 : vector<1x64xf32> to vector<16x64xf32>
    %6 = arith.addf %3, %5 : vector<16x64xf32>
    %7 = arith.truncf %6 : vector<16x64xf32> to vector<16x64xbf16>
    %c0_5 = arith.constant 0 : index
    %c0_6 = arith.constant 0 : index
    %8 = vector.load %arg5[%c0_5, %c0_6] : memref<16x64xbf16, #tpu.memory_space<vmem>>, vector<16x64xbf16>
    tpu.vector_store %arg5[%c0_5, %c0_6], %7 {strides = array<i32>} : memref<16x64xbf16, #tpu.memory_space<vmem>>, vector<16x64xbf16>,
    return
  }
  func.func @transform_0(%arg0: i32, %arg1: i32) -> (i32, i32) {
    %c0_i32 = arith.constant 0 : i32
    %c0_i32_0 = arith.constant 0 : i32
    return %arg0, %c0_i32 : i32, i32
  }
  func.func @transform_1(%arg0: i32, %arg1: i32) -> (i32, i32) {
    %c0_i32 = arith.constant 0 : i32
    %c0_i32_0 = arith.constant 0 : i32
    return %c0_i32, %arg1 : i32, i32
  }
  func.func @transform_2(%arg0: i32, %arg1: i32) -> (i32, i32) {
    %c0_i32 = arith.constant 0 : i32
    %c0_i32_0 = arith.constant 0 : i32
    return %c0_i32, %arg1 : i32, i32
  }
  func.func @transform_3(%arg0: i32, %arg1: i32) -> (i32, i32) {
    %c0_i32 = arith.constant 0 : i32
    return %arg0, %arg1 : i32, i32
  }
}

module attributes {stable_mosaic.version = 11 : i64} {
  func.func @_matmul_bias_kernel(%arg0: i32, %arg1: i32, %arg2: memref<16x32xf32, #tpu.memory_space<vmem>>, %arg3: memref<32x32xbf16, #tpu.memory_space<vmem>>, %arg4: memref<1x32xf32, #tpu.memory_space<vmem>>, %arg5: memref<16x32xbf16, #tpu.memory_space<vmem>>) attributes {dimension_semantics = [#tpu.dimension_semantics<parallel>, #tpu.dimension_semantics<parallel>], iteration_bounds = array<i64: 1, 1>, scalar_prefetch = 0 : i64, scratch_operands = 0 : i64, tpu.core_type = #tpu.core_type<tc>, window_params = [{transform_indices = @transform_0, window_bounds = array<i64: 16, 32>}, {transform_indices = @transform_1, window_bounds = array<i64: 32, 32>}, {transform_indices = @transform_2, window_bounds = array<i64: 1, 32>}, {transform_indices = @transform_3, window_bounds = array<i64: 16, 32>}]} {
    %c0 = arith.constant 0 : index
    %c0_0 = arith.constant 0 : index
    %0 = vector.load %arg2[%c0, %c0_0] : memref<16x32xf32, #tpu.memory_space<vmem>>, vector<16x32xf32>
    %1 = arith.truncf %0 : vector<16x32xf32> to vector<16x32xbf16>
    %c0_1 = arith.constant 0 : index
    %c0_2 = arith.constant 0 : index
    %2 = vector.load %arg3[%c0_1, %c0_2] : memref<32x32xbf16, #tpu.memory_space<vmem>>, vector<32x32xbf16>
    %cst = arith.constant dense<0.000000e+00> : vector<16x32xf32>
    %3 = tpu.matmul %1, %2, %cst {dimension_numbers = #tpu.dot_dimension_numbers<[1], [0], [0], [1], [0, 0, 1, 1], [], []>} : vector<16x32xbf16>, vector<32x32xbf16>, vector<16x32xf32> -> vector<16x32xf32>
    %c0_3 = arith.constant 0 : index
    %c0_4 = arith.constant 0 : index
    %4 = vector.load %arg4[%c0_3, %c0_4] : memref<1x32xf32, #tpu.memory_space<vmem>>, vector<1x32xf32>
    %5 = vector.broadcast %4 : vector<1x32xf32> to vector<16x32xf32>
    %6 = arith.addf %3, %5 : vector<16x32xf32>
    %7 = arith.truncf %6 : vector<16x32xf32> to vector<16x32xbf16>
    %c0_5 = arith.constant 0 : index
    %c0_6 = arith.constant 0 : index
    %8 = vector.load %arg5[%c0_5, %c0_6] : memref<16x32xbf16, #tpu.memory_space<vmem>>, vector<16x32xbf16>
    tpu.vector_store %arg5[%c0_5, %c0_6], %7 {strides = array<i32>} : memref<16x32xbf16, #tpu.memory_space<vmem>>, vector<16x32xbf16>,
    return
  }
  func.func @transform_0(%arg0: i32, %arg1: i32) -> (i32, i32) {
    %c0_i32 = arith.constant 0 : i32
    %c0_i32_0 = arith.constant 0 : i32
    return %arg0, %c0_i32 : i32, i32
  }
  func.func @transform_1(%arg0: i32, %arg1: i32) -> (i32, i32) {
    %c0_i32 = arith.constant 0 : i32
    %c0_i32_0 = arith.constant 0 : i32
    return %c0_i32, %arg1 : i32, i32
  }
  func.func @transform_2(%arg0: i32, %arg1: i32) -> (i32, i32) {
    %c0_i32 = arith.constant 0 : i32
    %c0_i32_0 = arith.constant 0 : i32
    return %c0_i32, %arg1 : i32, i32
  }
  func.func @transform_3(%arg0: i32, %arg1: i32) -> (i32, i32) {
    %c0_i32 = arith.constant 0 : i32
    return %arg0, %arg1 : i32, i32
  }
}

module attributes {stable_mosaic.version = 11 : i64} {
  func.func @_matmul_bias_kernel(%arg0: i32, %arg1: i32, %arg2: memref<16x32xf32, #tpu.memory_space<vmem>>, %arg3: memref<32x60xbf16, #tpu.memory_space<vmem>>, %arg4: memref<1x60xf32, #tpu.memory_space<vmem>>, %arg5: memref<16x60xf32, #tpu.memory_space<vmem>>) attributes {dimension_semantics = [#tpu.dimension_semantics<parallel>, #tpu.dimension_semantics<parallel>], iteration_bounds = array<i64: 1, 1>, scalar_prefetch = 0 : i64, scratch_operands = 0 : i64, tpu.core_type = #tpu.core_type<tc>, window_params = [{transform_indices = @transform_0, window_bounds = array<i64: 16, 32>}, {transform_indices = @transform_1, window_bounds = array<i64: 32, 60>}, {transform_indices = @transform_2, window_bounds = array<i64: 1, 60>}, {transform_indices = @transform_3, window_bounds = array<i64: 16, 60>}]} {
    %c0 = arith.constant 0 : index
    %c0_0 = arith.constant 0 : index
    %0 = vector.load %arg2[%c0, %c0_0] : memref<16x32xf32, #tpu.memory_space<vmem>>, vector<16x32xf32>
    %1 = arith.truncf %0 : vector<16x32xf32> to vector<16x32xbf16>
    %c0_1 = arith.constant 0 : index
    %c0_2 = arith.constant 0 : index
    %2 = vector.load %arg3[%c0_1, %c0_2] : memref<32x60xbf16, #tpu.memory_space<vmem>>, vector<32x60xbf16>
    %cst = arith.constant dense<0.000000e+00> : vector<16x60xf32>
    %3 = tpu.matmul %1, %2, %cst {dimension_numbers = #tpu.dot_dimension_numbers<[1], [0], [0], [1], [0, 0, 1, 1], [], []>} : vector<16x32xbf16>, vector<32x60xbf16>, vector<16x60xf32> -> vector<16x60xf32>
    %c0_3 = arith.constant 0 : index
    %c0_4 = arith.constant 0 : index
    %4 = vector.load %arg4[%c0_3, %c0_4] : memref<1x60xf32, #tpu.memory_space<vmem>>, vector<1x60xf32>
    %5 = vector.broadcast %4 : vector<1x60xf32> to vector<16x60xf32>
    %6 = arith.addf %3, %5 : vector<16x60xf32>
    %c0_5 = arith.constant 0 : index
    %c0_6 = arith.constant 0 : index
    %7 = vector.load %arg5[%c0_5, %c0_6] : memref<16x60xf32, #tpu.memory_space<vmem>>, vector<16x60xf32>
    tpu.vector_store %arg5[%c0_5, %c0_6], %6 {strides = array<i32>} : memref<16x60xf32, #tpu.memory_space<vmem>>, vector<16x60xf32>,
    return
  }
  func.func @transform_0(%arg0: i32, %arg1: i32) -> (i32, i32) {
    %c0_i32 = arith.constant 0 : i32
    %c0_i32_0 = arith.constant 0 : i32
    return %arg0, %c0_i32 : i32, i32
  }
  func.func @transform_1(%arg0: i32, %arg1: i32) -> (i32, i32) {
    %c0_i32 = arith.constant 0 : i32
    %c0_i32_0 = arith.constant 0 : i32
    return %c0_i32, %arg1 : i32, i32
  }
  func.func @transform_2(%arg0: i32, %arg1: i32) -> (i32, i32) {
    %c0_i32 = arith.constant 0 : i32
    %c0_i32_0 = arith.constant 0 : i32
    return %c0_i32, %arg1 : i32, i32
  }
  func.func @transform_3(%arg0: i32, %arg1: i32) -> (i32, i32) {
    %c0_i32 = arith.constant 0 : i32
    return %arg0, %arg1 : i32, i32
  }
}

</mosaic_0001>

<bundles_post_ra>
// kernel: transformer_forward.25
= control target key start
LH: loop header
LB: loop body
LE: loop exit
PB: predicated region body
PF: predicated region fallthrough
CT: control target
= control target key end

     0   :  { %v124_v0 = vmov 0.0   ;;  %vm125_vm0 = vmmov 0   ;;  %vm41_vm1 = vcmask 261120   ;;  %vm94_vm2 = vcmask 781312   ;;  %s167_s1 = inlined_call_operand.vmem [shape: bf16[32,96], index: 1, kind: input, shape index: {}]   ;;  %s168_s0 = inlined_call_operand.vmem [shape: f32[16,32], index: 0, kind: input, shape index: {}]   ;;  %s169_s2 = inlined_call_operand.vmem [shape: f32[1,96], index: 2, kind: input, shape index: {}]   ;;  %s170_s3 = inlined_call_operand.vmem [shape: bf16[16,96], index: 3, kind: output, shape index: {}]  }
   0x1   :  { %112 = vmatprep.subr.bf16.mxu0 %v124_v0  ;;  %v122_v1 = vld [vmem:[%s167_s1 + $0x8] sm:$0xff]   ;;  %116 = vmatprep.mubr.msk.bf16.mxu0 %vm125_vm0, %v124_v0  ;;  %v123_v2 = vld [vmem:[%s167_s1] sm:$0xff]  }
   0x2   :  { %113 = vmatpush3.bf16.msra.mxu0 %v122_v1  ;;  %v15_v3 = vld [vmem:[%s168_s0] sm:$0xff]  ;;  %v16_v4 = vld [vmem:[%s168_s0 + $0x8] sm:$0xff] }
   0x3   :  { %114 = vmatprep.subr.bf16.mxu0 %v124_v0  ;;  %v17_v5 = vpack.c.bf16 %v16_v4, %v15_v3  ;;  %v101_v6 = vld [vmem:[%s169_s2] ss:$0 sm:$0xff] }
   0x6   :  { %115 = vmatpush3.bf16.msra.mxu0 %v123_v2 }
   0x9   :  { %117 = vmatmul.mubr.msk.bf16.vlgmr.msra.gmra.mxu0 %vm41_vm1, %v17_v5 }
  0xc9   :  { %v79_v7 = vpop.f32.mrf.mxu0 }
  0xca   :  { %v80_v8 = vadd.f32 %v101_v6, %v79_v7 }
  0xcb   :  { %v118_v9 = vpop.f32.mrf.mxu0 }
  0xcc   :  { %v107_v10 = vpack.c.bf16 %v80_v8, %v80_v8 }
  0xcd   :  { %v82_v11 = vpop.f32.mrf.mxu0 }
  0xce   :  { %95 = vst.msk [vmem:[%s170_s3] sm:$0xf] %vm94_vm2, %v107_v10  ;;  %v83_v12 = vadd.f32 %v101_v6, %v82_v11 }
  0xcf   :  { %v119_v13 = vpop.f32.mrf.mxu0 }
  0xd0   :  { %v108_v14 = vpack.c.bf16 %v83_v12, %v83_v12 }
  0xd2   :  { %96 = vst.msk [vmem:[%s170_s3 + $0x4] sm:$0xf] %vm94_vm2, %v108_v14 }

// kernel: transformer_forward.27
= control target key start
LH: loop header
LB: loop body
LE: loop exit
PB: predicated region body
PF: predicated region fallthrough
CT: control target
= control target key end

     0   :  { %v168_v0 = vmov 0.0   ;;  %vm169_vm0 = vmmov 0   ;;  %vm46_vm1 = vcmask 261120   ;;  %s234_s1 = inlined_call_operand.vmem [shape: bf16[32,32], index: 1, kind: input, shape index: {}]   ;;  %s235_s0 = inlined_call_operand.vmem [shape: bf16[16,32], index: 0, kind: input, shape index: {}]   ;;  %s236_s2 = inlined_call_operand.vmem [shape: f32[16,32], index: 2, kind: input, shape index: {}]   ;;  %s237_s3 = inlined_call_operand.vmem [shape: f32[1,32], index: 3, kind: input, shape index: {}]   ;;  %s238_s4 = inlined_call_operand.vmem [shape: f32[1,32], index: 4, kind: input, shape index: {}]   ;;  %s239_s5 = inlined_call_operand.vmem [shape: f32[16,32], index: 5, kind: output, shape index: {}]  }
   0x1   :  { %151 = vmatprep.subr.bf16.mxu0 %v168_v0  ;;  %v161_v1 = vld [vmem:[%s234_s1 + $0x8] sm:$0xff]   ;;  %155 = vmatprep.mubr.msk.bf16.mxu0 %vm169_vm0, %v168_v0  ;;  %v162_v2 = vld [vmem:[%s234_s1] sm:$0xff]  }
   0x2   :  { %152 = vmatpush3.bf16.msra.mxu0 %v161_v1  ;;  %v163_v3 = vld [vmem:[%s235_s0] sm:$0xff]   ;;  %v28_v8 = vld [vmem:[%s236_s2 + $0x8] sm:$0xff] }
   0x3   :  { %153 = vmatprep.subr.bf16.mxu0 %v168_v0  ;;  %v27_v4 = vld [vmem:[%s236_s2] sm:$0xff] }
   0x4   :  { %v146_v31 = vld [vmem:[%s237_s3] ss:$0 sm:$0xff] }
   0x5   :  { %v147_v33 = vld [vmem:[%s238_s4] ss:$0 sm:$0xff] }
   0x6   :  { %154 = vmatpush3.bf16.msra.mxu0 %v162_v2 }
   0x9   :  { %156 = vmatmul.mubr.msk.bf16.vlgmr.msra.gmra.mxu0 %vm46_vm1, %v163_v3 }
  0xc9   :  { %v84_v5 = vpop.f32.mrf.mxu0 }
  0xca   :  { %v85_v6 = vadd.f32 %v84_v5, %v27_v4 }
  0xcb   :  { %v157_v7 = vpop.f32.mrf.mxu0 }
  0xcc   :  { %v91_v9 = vsel %vm46_vm1, %v85_v6, 0.0 }
  0xcd   :  { %92 = vadd.xlane.f32.xlu0 %v91_v9  ;;  %v87_v10 = vpop.f32.mrf.mxu0 }
  0xce   :  { %v88_v11 = vadd.f32 %v87_v10, %v28_v8 }
  0xcf   :  { %v158_v12 = vpop.f32.mrf.mxu0 }
  0xd0   :  { %v94_v13 = vsel %vm46_vm1, %v88_v11, 0.0 }
  0xd1   :  { %95 = vadd.xlane.f32.xlu0 %v94_v13 }
 0x156   :  { %v93_v14 = vpop.xlane.xlu0 %92 }
 0x157   :  { %v98_v15 = vmul.f32 0.03125, %v93_v14 }
 0x159   :  { %v100_v16 = vsub.f32 %v85_v6, %v98_v15 }
 0x15a   :  { %v96_v17 = vpop.xlane.xlu0 %95 }
 0x15b   :  { %v99_v18 = vmul.f32 0.03125, %v96_v17  ;;  %v102_v19 = vmul.f32 %v100_v16, %v100_v16 }
 0x15d   :  { %v101_v20 = vsub.f32 %v88_v11, %v99_v18  ;;  %v104_v21 = vsel %vm46_vm1, %v102_v19, 0.0 }
 0x15e   :  { %105 = vadd.xlane.f32.xlu1 %v104_v21 }
 0x15f   :  { %v103_v22 = vmul.f32 %v101_v20, %v101_v20 }
 0x161   :  { %v107_v23 = vsel %vm46_vm1, %v103_v22, 0.0 }
 0x162   :  { %108 = vadd.xlane.f32.xlu1 %v107_v23 }
 0x1e7   :  { %v106_v24 = vpop.xlane.xlu1 %105 }
 0x1e8   :  { %v110_v25 = vmul.f32 0.03125, %v106_v24 }
 0x1ea   :  { %v112_v26 = vadd.f32 1e-05, %v110_v25 }
 0x1eb   :  { %v109_v27 = vpop.xlane.xlu1 %108 }
 0x1ec   :  { %164 = vrsqrt.f32 %v112_v26  ;;  %v111_v28 = vmul.f32 0.03125, %v109_v27 }
 0x1ee   :  { %v113_v29 = vadd.f32 1e-05, %v111_v28 }
 0x1f0   :  { %166 = vrsqrt.f32 %v113_v29 }
 0x1f9   :  { %v165_v30 = vpop.eup %164 }
 0x1fa   :  { %v116_v32 = vmul.f32 %v165_v30, %v100_v16 }
 0x1fc   :  { %v125_v34 = vmul.f32 %v146_v31, %v116_v32 }
 0x1fd   :  { %v167_v35 = vpop.eup %166 }
 0x1fe   :  { %v134_v36 = vadd.f32 %v147_v33, %v125_v34  ;;  %v117_v37 = vmul.f32 %v167_v35, %v101_v20 }
 0x200   :  { %136 = vst.msk [vmem:[%s239_s5] sm:$0xff] %vm46_vm1, %v134_v36  ;;  %v126_v38 = vmul.f32 %v146_v31, %v117_v37 }
 0x202   :  { %v135_v39 = vadd.f32 %v147_v33, %v126_v38 }
 0x204   :  { %137 = vst.msk [vmem:[%s239_s5 + $0x8] sm:$0xff] %vm46_vm1, %v135_v39 }

// kernel: transformer_forward.26
= control target key start
LH: loop header
LB: loop body
LE: loop exit
PB: predicated region body
PF: predicated region fallthrough
CT: control target
= control target key end

     0   :  { %s721_s15 = smov 0   ;;  %s723_s16 = smov 0   ;;  %s780_s0 = inlined_call_operand.vmem [shape: bf16[8,8,8], index: 0, kind: input, shape index: {}]   ;;  %s781_s1 = inlined_call_operand.vmem [shape: bf16[8,8,8], index: 1, kind: input, shape index: {}]   ;;  %s782_s2 = inlined_call_operand.vmem [shape: bf16[8,8,8], index: 2, kind: input, shape index: {}]   ;;  %s783_s3 = inlined_call_operand.vmem [shape: f32[8,8], index: 3, kind: input, shape index: {}]   ;;  %s784_s4 = inlined_call_operand.vmem [shape: bf16[8,8,8], index: 4, kind: output, shape index: {}]  }
   0x1   :  { %s725_s17 = smov 0  }
   0x2 LB: > { %s33_s18 = sadd.s32 1, %s686_s16  ;;  %p607_p0 = scmp.ge.s32.totalorder %s690_s17, 1  ;;  %s690_s17 = sphi %s725_s17, %s14_s17   ;;  %s686_s16 = sphi %s723_s16, %s786_s16   ;;  %s682_s15 = sphi %s721_s15, %s785_s15  }
   0x3   : > { %p35_p1 = scmp.ge.s32.totalorder %s33_s18, 8  ;;  %p229_p2 = scmp.lt.s32.totalorder %s690_s17, 9 }
   0x5   : > { %s788_s18 = smov (%p35_p1, %s33_s18), 0  ;;  %p230_p3 = pnand %p607_p0, %p229_p2 }
   0x6   : > { %p280_p4 = scmp.lt.s32.totalorder (!%p230_p3), %s682_s15, 7 }
   0x7   : > { %233 = sbr.rel (%p230_p3) target bundleno = 794 (0x31a), region = 36 }
   0xc   : > { %vm323_vm0 = vcmask 64512   ;;  %v692_v0 = vmov 0.0   ;;  %vm693_vm1 = vmmov 0   ;;  %s790_s15 = smov (!%p280_p4, %s682_s15), 7  ;;  %vm320_vm2 = vcmask 7168   ;;  %v331_v8 = vld [vmem:[%s783_s3] sm:$0xff] }
   0xd   : > { %620 = vmatprep.subr.bf16.mxu0 %v692_v0  ;;  %324 = vst.msk [vmem:[#allocation4] sm:$0xff] %vm323_vm0, %v692_v0  ;;  %622 = vmatprep.mubr.msk.bf16.mxu0 %vm693_vm1, %v692_v0  ;;  %s740_s19 = sshll.u32 %s790_s15, 2  ;;  %v694_v7 = vmov -inf   ;;  %v695_v15 = vmov 0   ;;  %vm414_vm3 = vcmask 1043456   ;;  %vm474_vm4 = vcmask 60416  }
   0xe   : > { %626 = vmatprep.subr.bf16.mxu1 %v692_v0  ;;  %628 = vmatprep.mubr.msk.bf16.mxu1 %vm693_vm1, %v692_v0  ;;  %s293_s22 = scalar_lea.vmem %s781_s1, %s740_s19  ;;  %s286_s25 = scalar_lea.vmem %s780_s0, %s740_s19  ;;  %321 = vst.msk [vmem:[#allocation2] sm:$0xff] %vm320_vm2, %v694_v7  ;;  %322 = vst.msk [vmem:[#allocation3] sm:$0xff] %vm320_vm2, %v692_v0 }
   0xf   : > { %v329_v1 = vld [vmem:[%s293_s22] sm:$0xf]  ;;  %660 = vset.pattern.permute.xlu0 %v695_v15  ;;  %661 = vset.pattern.permute.xlu1 %v695_v15  ;;  %s300_s30 = scalar_lea.vmem %s782_s2, %s740_s19  ;;  %s314_s7 = scalar_lea.vmem %s784_s4, %s740_s19 }
  0x10   : > { %v325_v2 = vld [vmem:[%s286_s25] sm:$0xf]  ;;  %v337_v3 = vsel %vm323_vm0, %v329_v1, 0 }
  0x11   : > { %v326_v4 = vunpack.c.l.bf16 %v325_v2  ;;  %621 = vmatpush3.bf16.xpose.msra.mxu0 %v337_v3  ;;  %v330_v20 = vld [vmem:[%s300_s30] sm:$0xf] }
  0x12   : > { %v416_v21 = vsel %vm414_vm3, %v330_v20, 0 }
  0x13   : > { %v327_v5 = vmul.f32 0.35355338, %v326_v4  ;;  %627 = vmatpush3.bf16.msra.mxu1 %v416_v21 }
  0x14   : > { %v403_v36 = vld [vmem:[#allocation4] sm:$0xff] }
  0x15   : > { %v328_v6 = vpack.c.bf16 %v327_v5, %v327_v5  ;;  %v379_v16 = vld [vmem:[#allocation2] sm:$0xff]  ;;  %v395_v30 = vld [vmem:[#allocation3] sm:$0xff] }
  0x18   : > { %623 = vmatmul.mubr.msk.bf16.vlgmr.msra.gmra.mxu0 %vm323_vm0, %v328_v6 }
  0xd8   : > { %v373_v9 = vpop.f32.mrf.mxu0 }
  0xd9   : > { %v374_v10 = vadd.f32 %v373_v9, %v331_v8 }
  0xda   : > { %v624_v11 = vpop.f32.mrf.mxu0 }
  0xdb   : > { %v380_v12 = vsel %vm323_vm0, %v374_v10, -inf }
  0xdc   : > { %381 = vmax.xlane.f32.xlu0 %v380_v12  ;;  %v376_v13 = vpop.f32.mrf.mxu0 }
  0xde   : > { %v625_v14 = vpop.f32.mrf.mxu0 }
 0x165   : > { %v382_v17 = vpop.xlane.xlu0 %381 }
 0x166   : > { %v383_v18 = vmax.f32 %v379_v16, %v382_v17 }
 0x168   : > { %v384_v19 = vsub.f32 %v379_v16, %v383_v18  ;;  %460 = vst.msk [vmem:[#allocation2] sm:$0xff] %vm320_vm2, %v383_v18  ;;  %389 = vperm.xlu0 %660, %v383_v18  }
 0x16a   : > { %v385_v26 = vmul.f32 1.442695, %v384_v19 }
 0x1e3   : > { %v390_v22 = vpop.permute.xlu0 %389 }
 0x1e4   : > { %v392_v23 = vsub.f32 %v374_v10, %v390_v22 }
 0x1e6   : > { %v393_v24 = vmul.f32 1.442695, %v392_v23 }
 0x1e8   : > { %662 = vpow2.f32 %v393_v24 }
 0x1e9   : > { %664 = vpow2.f32 %v385_v26 }
 0x1f5   : > { %v663_v25 = vpop.eup %662 }
 0x1f6   : > { %v397_v27 = vsel %vm323_vm0, %v663_v25, 0.0  ;;  %v410_v28 = vpack.c.bf16 %v663_v25, %v663_v25  ;;  %v665_v29 = vpop.eup %664 }
 0x1f7   : > { %398 = vadd.xlane.f32.xlu1 %v397_v27  ;;  %v396_v31 = vmul.f32 %v665_v29, %v395_v30 }
 0x1f8   : > { %629 = vmatmul.mubr.msk.bf16.vlgmr.msra.gmra.mxu1 %vm323_vm0, %v410_v28 }
 0x208   : > { %406 = vperm.xlu1 %661, %v665_v29  }
 0x280   : > { %v399_v32 = vpop.xlane.xlu1 %398 }
 0x281   : > { %v400_v33 = vadd.f32 %v399_v32, %v396_v31 }
 0x283   : > { %402 = vst.msk [vmem:[#allocation3] sm:$0xff] %vm320_vm2, %v400_v33 }
 0x284   : > { %v407_v37 = vpop.permute.xlu1 %406 }
 0x285   : > { %v409_v38 = vmul.f32 %v407_v37, %v403_v36 }
 0x28a   : > { %v465_v34 = vld [vmem:[#allocation3] sm:$0xff] }
 0x28b   : > { %666 = vrcp.f32 %v465_v34 }
 0x298   : > { %v667_v35 = vpop.eup %666 }
 0x299   : > { %469 = vperm.xlu1 %661, %v667_v35  }
 0x2b8   : > { %v452_v39 = vpop.f32.mrf.mxu1 }
 0x2b9   : > { %v458_v40 = vadd.f32 %v452_v39, %v409_v38 }
 0x2ba   : > { %v630_v41 = vpop.f32.mrf.mxu1 }
 0x2bb   : > { %459 = vst.msk [vmem:[#allocation4] sm:$0xff] %vm323_vm0, %v458_v40 }
 0x2bc   : > { %v455_v42 = vpop.f32.mrf.mxu1 }
 0x2be   : > { %v631_v43 = vpop.f32.mrf.mxu1 }
 0x2c2   : > { %v464_v44 = vld [vmem:[#allocation4] sm:$0xff] }
 0x314   : > { %v470_v45 = vpop.permute.xlu1 %469 }
 0x315   : > { %v472_v46 = vmul.f32 %v470_v45, %v464_v44 }
 0x317   : > { %v473_v47 = vpack.c.bf16 %v472_v46, %v472_v46 }
 0x319   : > { %475 = vst.msk [vmem:[%s314_s7] sm:$0xf] %vm474_vm4, %v473_v47 }
 0x31a PF: > { %s14_s17 = sadd.s32 1, %s690_s17   ;;  %s785_s15 = smov %s686_s16 }
 0x31b   : > { %p11_p5 = scmp.ge.s32.totalorder %s14_s17, 10   ;;  %s786_s16 = smov %s788_s18 }
 0x31d   :  { %13 = sbr.rel (!%p11_p5) target bundleno = 2 (0x2), region = 83 }

// kernel: transformer_forward.28
= control target key start
LH: loop header
LB: loop body
LE: loop exit
PB: predicated region body
PF: predicated region fallthrough
CT: control target
= control target key end

     0   :  { %vm31_vm0 = vcmask 261120   ;;  %v359_v0 = vmov 0.0   ;;  %vm360_vm1 = vmmov 0   ;;  %s466_s1 = inlined_call_operand.vmem [shape: bf16[32,128], index: 1, kind: input, shape index: {}]   ;;  %s467_s0 = inlined_call_operand.vmem [shape: f32[16,32], index: 0, kind: input, shape index: {}]   ;;  %s468_s3 = inlined_call_operand.vmem [shape: bf16[128,32], index: 3, kind: input, shape index: {}]   ;;  %s469_s2 = inlined_call_operand.vmem [shape: f32[1,128], index: 2, kind: input, shape index: {}]   ;;  %s470_s4 = inlined_call_operand.vmem [shape: f32[1,32], index: 4, kind: input, shape index: {}]   ;;  %s471_s5 = inlined_call_operand.vmem [shape: f32[1,32], index: 5, kind: input, shape index: {}]   ;;  %s472_s6 = inlined_call_operand.vmem [shape: f32[1,32], index: 6, kind: input, shape index: {}]   ;;  %s473_s7 = inlined_call_operand.vmem [shape: f32[16,32], index: 7, kind: output, shape index: {}]  }
   0x1   :  { %315 = vmatprep.subr.bf16.mxu0 %v359_v0  ;;  %v345_v1 = vld [vmem:[%s466_s1 + $0x8] sm:$0xff]   ;;  %319 = vmatprep.mubr.msk.bf16.mxu0 %vm360_vm1, %v359_v0  ;;  %32 = vst.msk [vmem:[#allocation2] sm:$0xff] %vm31_vm0, %v359_v0  ;;  %33 = vst.msk [vmem:[#allocation2 + $0x8] sm:$0xff] %vm31_vm0, %v359_v0  ;;  %v346_v2 = vld [vmem:[%s466_s1] sm:$0xff]  }
   0x2   :  { %323 = vmatprep.subr.bf16.mxu1 %v359_v0  ;;  %339 = vmatprep.mubr.msk.bf16.mxu1 %vm360_vm1, %v359_v0  ;;  %v34_v3 = vld [vmem:[%s467_s0] sm:$0xff]  ;;  %v35_v4 = vld [vmem:[%s467_s0 + $0x8] sm:$0xff]  ;;  %v347_v5 = vld [vmem:[%s468_s3 + $0x38] sm:$0xff]  }
   0x3   :  { %316 = vmatpush3.bf16.msra.mxu0 %v345_v1  ;;  %v36_v6 = vpack.c.bf16 %v35_v4, %v34_v3  ;;  %324 = vmatpush3.bf16.msra.mxu1 %v347_v5  ;;  %v348_v7 = vld [vmem:[%s468_s3 + $0x30] sm:$0xff]   ;;  %v349_v8 = vld [vmem:[%s468_s3 + $0x28] sm:$0xff]   ;;  %v350_v9 = vld [vmem:[%s468_s3 + $0x20] sm:$0xff]  }
   0x4   :  { %317 = vmatprep.subr.bf16.mxu0 %v359_v0  ;;  %325 = vmatprep.subr.bf16.mxu1 %v359_v0  ;;  %v351_v10 = vld [vmem:[%s468_s3 + $0x18] sm:$0xff]   ;;  %v352_v11 = vld [vmem:[%s468_s3 + $0x10] sm:$0xff]   ;;  %v353_v12 = vld [vmem:[%s468_s3 + $0x8] sm:$0xff]  }
   0x5   :  { %v354_v13 = vld [vmem:[%s468_s3] sm:$0xff]  }
   0x6   :  { %v288_v14 = vld [vmem:[%s469_s2] ss:$0 sm:$0xff] }
   0x7   :  { %318 = vmatpush3.bf16.msra.mxu0 %v346_v2  ;;  %326 = vmatpush3.bf16.msra.mxu1 %v348_v7  ;;  %v300_v33 = vld [vmem:[%s470_s4] ss:$0 sm:$0xff] }
   0x8   :  { %327 = vmatprep.subr.bf16.mxu1 %v359_v0  ;;  %v107_v24 = vld [vmem:[#allocation2] sm:$0xff]  ;;  %v108_v28 = vld [vmem:[#allocation2 + $0x8] sm:$0xff] }
   0x9   :  { %v301_v58 = vld [vmem:[%s471_s5] ss:$0 sm:$0xff] }
   0xa   :  { %320 = vmatmul.mubr.msk.bf16.vlgmr.msra.gmra.mxu0 %vm31_vm0, %v36_v6  ;;  %v302_v60 = vld [vmem:[%s472_s6] ss:$0 sm:$0xff] }
   0xb   :  { %328 = vmatpush3.bf16.msra.mxu1 %v349_v8 }
   0xc   :  { %329 = vmatprep.subr.bf16.mxu1 %v359_v0 }
   0xf   :  { %330 = vmatpush3.bf16.msra.mxu1 %v350_v9 }
  0x10   :  { %331 = vmatprep.subr.bf16.mxu1 %v359_v0 }
  0x13   :  { %332 = vmatpush3.bf16.msra.mxu1 %v351_v10 }
  0x14   :  { %333 = vmatprep.subr.bf16.mxu1 %v359_v0 }
  0x17   :  { %334 = vmatpush3.bf16.msra.mxu1 %v352_v11 }
  0x18   :  { %335 = vmatprep.subr.bf16.mxu1 %v359_v0 }
  0x1b   :  { %336 = vmatpush3.bf16.msra.mxu1 %v353_v12 }
  0x1c   :  { %337 = vmatprep.subr.bf16.mxu1 %v359_v0 }
  0x1f   :  { %338 = vmatpush3.bf16.msra.mxu1 %v354_v13 }
  0xca   :  { %v98_v15 = vpop.f32.mrf.mxu0 }
  0xcb   :  { %v99_v17 = vadd.f32 %v288_v14, %v98_v15 }
  0xcc   :  { %v321_v16 = vpop.f32.mrf.mxu0 }
  0xcd   :  { %v105_v21 = vmax.f32 %v99_v17, 0.0 }
  0xce   :  { %v101_v18 = vpop.f32.mrf.mxu0 }
  0xcf   :  { %v102_v19 = vadd.f32 %v288_v14, %v101_v18 }
  0xd0   :  { %v322_v20 = vpop.f32.mrf.mxu0 }
  0xd1   :  { %v106_v22 = vmax.f32 %v102_v19, 0.0 }
  0xd3   :  { %v109_v23 = vpack.c.bf16 %v106_v22, %v105_v21 }
  0xd5   :  { %340 = vmatmul.mubr.bf16.vlgmr.msra.gmra.mxu1 %v109_v23 }
 0x195   :  { %v208_v25 = vpop.f32.mrf.mxu1 }
 0x196   :  { %v215_v26 = vadd.f32 %v208_v25, %v107_v24 }
 0x197   :  { %v341_v27 = vpop.f32.mrf.mxu1 }
 0x198   :  { %217 = vst.msk [vmem:[#allocation2] sm:$0xff] %vm31_vm0, %v215_v26 }
 0x199   :  { %v211_v29 = vpop.f32.mrf.mxu1 }
 0x19a   :  { %v216_v30 = vadd.f32 %v211_v29, %v108_v28 }
 0x19b   :  { %v342_v31 = vpop.f32.mrf.mxu1 }
 0x19c   :  { %218 = vst.msk [vmem:[#allocation2 + $0x8] sm:$0xff] %vm31_vm0, %v216_v30 }
 0x19f   :  { %v224_v32 = vld [vmem:[#allocation2] sm:$0xff] }
 0x1a0   :  { %v226_v34 = vadd.f32 %v224_v32, %v34_v3 }
 0x1a2   :  { %v235_v35 = vadd.f32 %v300_v33, %v226_v34 }
 0x1a3   :  { %v225_v36 = vld [vmem:[#allocation2 + $0x8] sm:$0xff] }
 0x1a4   :  { %v237_v37 = vsel %vm31_vm0, %v235_v35, 0.0  ;;  %v227_v38 = vadd.f32 %v225_v36, %v35_v4 }
 0x1a5   :  { %238 = vadd.xlane.f32.xlu0 %v237_v37 }
 0x1a6   :  { %v236_v39 = vadd.f32 %v300_v33, %v227_v38 }
 0x1a8   :  { %v240_v40 = vsel %vm31_vm0, %v236_v39, 0.0 }
 0x1a9   :  { %241 = vadd.xlane.f32.xlu0 %v240_v40 }
 0x22e   :  { %v239_v41 = vpop.xlane.xlu0 %238 }
 0x22f   :  { %v244_v42 = vmul.f32 0.03125, %v239_v41 }
 0x231   :  { %v246_v43 = vsub.f32 %v235_v35, %v244_v42 }
 0x232   :  { %v242_v44 = vpop.xlane.xlu0 %241 }
 0x233   :  { %v245_v45 = vmul.f32 0.03125, %v242_v44  ;;  %v248_v46 = vmul.f32 %v246_v43, %v246_v43 }
 0x235   :  { %v247_v47 = vsub.f32 %v236_v39, %v245_v45  ;;  %v250_v48 = vsel %vm31_vm0, %v248_v46, 0.0 }
 0x236   :  { %251 = vadd.xlane.f32.xlu1 %v250_v48 }
 0x237   :  { %v249_v49 = vmul.f32 %v247_v47, %v247_v47 }
 0x239   :  { %v253_v50 = vsel %vm31_vm0, %v249_v49, 0.0 }
 0x23a   :  { %254 = vadd.xlane.f32.xlu1 %v253_v50 }
 0x2bf   :  { %v252_v51 = vpop.xlane.xlu1 %251 }
 0x2c0   :  { %v256_v52 = vmul.f32 0.03125, %v252_v51 }
 0x2c2   :  { %v258_v53 = vadd.f32 1e-05, %v256_v52 }
 0x2c3   :  { %v255_v54 = vpop.xlane.xlu1 %254 }
 0x2c4   :  { %355 = vrsqrt.f32 %v258_v53  ;;  %v257_v55 = vmul.f32 0.03125, %v255_v54 }
 0x2c6   :  { %v259_v56 = vadd.f32 1e-05, %v257_v55 }
 0x2c8   :  { %357 = vrsqrt.f32 %v259_v56 }
 0x2d1   :  { %v356_v57 = vpop.eup %355 }
 0x2d2   :  { %v262_v59 = vmul.f32 %v356_v57, %v246_v43 }
 0x2d4   :  { %v271_v61 = vmul.f32 %v301_v58, %v262_v59 }
 0x2d5   :  { %v358_v62 = vpop.eup %357 }
 0x2d6   :  { %v280_v63 = vadd.f32 %v302_v60, %v271_v61  ;;  %v263_v0 = vmul.f32 %v358_v62, %v247_v47 }
 0x2d8   :  { %282 = vst.msk [vmem:[%s473_s7] sm:$0xff] %vm31_vm0, %v280_v63  ;;  %v272_v1 = vmul.f32 %v301_v58, %v263_v0 }
 0x2da   :  { %v281_v2 = vadd.f32 %v302_v60, %v272_v1 }
 0x2dc   :  { %283 = vst.msk [vmem:[%s473_s7 + $0x8] sm:$0xff] %vm31_vm0, %v281_v2 }

// kernel: transformer_forward.36
= control target key start
LH: loop header
LB: loop body
LE: loop exit
PB: predicated region body
PF: predicated region fallthrough
CT: control target
= control target key end

     0   :  { %v124_v0 = vmov 0.0   ;;  %vm125_vm0 = vmmov 0   ;;  %vm41_vm1 = vcmask 261120   ;;  %vm94_vm2 = vcmask 519168   ;;  %s167_s1 = inlined_call_operand.vmem [shape: bf16[32,64], index: 1, kind: input, shape index: {}]   ;;  %s168_s0 = inlined_call_operand.vmem [shape: f32[16,32], index: 0, kind: input, shape index: {}]   ;;  %s169_s2 = inlined_call_operand.vmem [shape: f32[1,64], index: 2, kind: input, shape index: {}]   ;;  %s170_s3 = inlined_call_operand.vmem [shape: bf16[16,64], index: 3, kind: output, shape index: {}]  }
   0x1   :  { %112 = vmatprep.subr.bf16.mxu0 %v124_v0  ;;  %v122_v1 = vld [vmem:[%s167_s1 + $0x8] sm:$0xff]   ;;  %116 = vmatprep.mubr.msk.bf16.mxu0 %vm125_vm0, %v124_v0  ;;  %v123_v2 = vld [vmem:[%s167_s1] sm:$0xff]  }
   0x2   :  { %113 = vmatpush3.bf16.msra.mxu0 %v122_v1  ;;  %v15_v3 = vld [vmem:[%s168_s0] sm:$0xff]  ;;  %v16_v4 = vld [vmem:[%s168_s0 + $0x8] sm:$0xff] }
   0x3   :  { %114 = vmatprep.subr.bf16.mxu0 %v124_v0  ;;  %v17_v5 = vpack.c.bf16 %v16_v4, %v15_v3  ;;  %v101_v6 = vld [vmem:[%s169_s2] ss:$0 sm:$0xff] }
   0x6   :  { %115 = vmatpush3.bf16.msra.mxu0 %v123_v2 }
   0x9   :  { %117 = vmatmul.mubr.msk.bf16.vlgmr.msra.gmra.mxu0 %vm41_vm1, %v17_v5 }
  0xc9   :  { %v79_v7 = vpop.f32.mrf.mxu0 }
  0xca   :  { %v80_v8 = vadd.f32 %v101_v6, %v79_v7 }
  0xcb   :  { %v118_v9 = vpop.f32.mrf.mxu0 }
  0xcc   :  { %v107_v10 = vpack.c.bf16 %v80_v8, %v80_v8 }
  0xcd   :  { %v82_v11 = vpop.f32.mrf.mxu0 }
  0xce   :  { %95 = vst.msk [vmem:[%s170_s3] sm:$0xf] %vm94_vm2, %v107_v10  ;;  %v83_v12 = vadd.f32 %v101_v6, %v82_v11 }
  0xcf   :  { %v119_v13 = vpop.f32.mrf.mxu0 }
  0xd0   :  { %v108_v14 = vpack.c.bf16 %v83_v12, %v83_v12 }
  0xd2   :  { %96 = vst.msk [vmem:[%s170_s3 + $0x4] sm:$0xf] %vm94_vm2, %v108_v14 }

// kernel: transformer_forward.37
= control target key start
LH: loop header
LB: loop body
LE: loop exit
PB: predicated region body
PF: predicated region fallthrough
CT: control target
= control target key end

     0   :  { %v124_v0 = vmov 0.0   ;;  %vm125_vm0 = vmmov 0   ;;  %vm41_vm1 = vcmask 261120   ;;  %vm94_vm2 = vcmask 257024   ;;  %s167_s1 = inlined_call_operand.vmem [shape: bf16[32,32], index: 1, kind: input, shape index: {}]   ;;  %s168_s0 = inlined_call_operand.vmem [shape: f32[16,32], index: 0, kind: input, shape index: {}]   ;;  %s169_s2 = inlined_call_operand.vmem [shape: f32[1,32], index: 2, kind: input, shape index: {}]   ;;  %s170_s3 = inlined_call_operand.vmem [shape: bf16[16,32], index: 3, kind: output, shape index: {}]  }
   0x1   :  { %112 = vmatprep.subr.bf16.mxu0 %v124_v0  ;;  %v122_v1 = vld [vmem:[%s167_s1 + $0x8] sm:$0xff]   ;;  %116 = vmatprep.mubr.msk.bf16.mxu0 %vm125_vm0, %v124_v0  ;;  %v123_v2 = vld [vmem:[%s167_s1] sm:$0xff]  }
   0x2   :  { %113 = vmatpush3.bf16.msra.mxu0 %v122_v1  ;;  %v15_v3 = vld [vmem:[%s168_s0] sm:$0xff]  ;;  %v16_v4 = vld [vmem:[%s168_s0 + $0x8] sm:$0xff] }
   0x3   :  { %114 = vmatprep.subr.bf16.mxu0 %v124_v0  ;;  %v17_v5 = vpack.c.bf16 %v16_v4, %v15_v3  ;;  %v101_v6 = vld [vmem:[%s169_s2] ss:$0 sm:$0xff] }
   0x6   :  { %115 = vmatpush3.bf16.msra.mxu0 %v123_v2 }
   0x9   :  { %117 = vmatmul.mubr.msk.bf16.vlgmr.msra.gmra.mxu0 %vm41_vm1, %v17_v5 }
  0xc9   :  { %v79_v7 = vpop.f32.mrf.mxu0 }
  0xca   :  { %v80_v8 = vadd.f32 %v101_v6, %v79_v7 }
  0xcb   :  { %v118_v9 = vpop.f32.mrf.mxu0 }
  0xcc   :  { %v107_v10 = vpack.c.bf16 %v80_v8, %v80_v8 }
  0xcd   :  { %v82_v11 = vpop.f32.mrf.mxu0 }
  0xce   :  { %95 = vst.msk [vmem:[%s170_s3] sm:$0xf] %vm94_vm2, %v107_v10  ;;  %v83_v12 = vadd.f32 %v101_v6, %v82_v11 }
  0xcf   :  { %v119_v13 = vpop.f32.mrf.mxu0 }
  0xd0   :  { %v108_v14 = vpack.c.bf16 %v83_v12, %v83_v12 }
  0xd2   :  { %96 = vst.msk [vmem:[%s170_s3 + $0x4] sm:$0xf] %vm94_vm2, %v108_v14 }

// kernel: transformer_forward.49
= control target key start
LH: loop header
LB: loop body
LE: loop exit
PB: predicated region body
PF: predicated region fallthrough
CT: control target
= control target key end

     0   :  { %v150_v1 = vmov 0.0   ;;  %vm151_vm0 = vmmov 0   ;;  %s193_s0 = inlined_call_operand.vmem [shape: f32[16,32], index: 0, kind: input, shape index: {}]   ;;  %s194_s1 = inlined_call_operand.vmem [shape: bf16[32,60], index: 1, kind: input, shape index: {}]   ;;  %s195_s2 = inlined_call_operand.vmem [shape: f32[1,60], index: 2, kind: input, shape index: {}]   ;;  %s196_s3 = inlined_call_operand.hbm [shape: f32[16,60], index: 3, kind: output, shape index: {}]  }
   0x1   :  { %v126_v0 = vld [vmem:[%s194_s1 + $0x8] sm:$0xff]   ;;  %113 = vmatprep.subr.bf16.mxu0 %v150_v1  ;;  %v127_v2 = vld [vmem:[%s194_s1] sm:$0xff]   ;;  %117 = vmatprep.mubr.msk.bf16.mxu0 %vm151_vm0, %v150_v1 }
   0x2   :  { %114 = vmatpush3.bf16.msra.mxu0 %v126_v0  ;;  %v16_v3 = vld [vmem:[%s193_s0] sm:$0xff]  ;;  %v17_v4 = vld [vmem:[%s193_s0 + $0x8] sm:$0xff] }
   0x3   :  { %115 = vmatprep.subr.bf16.mxu0 %v150_v1 }
   0x4   :  { %8 = vsyncpa [#allocation3], 0  ;;  %v18_v5 = vpack.c.bf16 %v17_v4, %v16_v3  ;;  %vm42_vm1 = vcmask 261120   ;;  %v106_v6 = vld [vmem:[%s195_s2] ss:$0 sm:$0xff]  ;;  %vm87_vm2 = vcmask 490496  }
   0x5   :  { %s152_s1 = smov [#allocation2]  }
   0x6   :  { %116 = vmatpush3.bf16.msra.mxu0 %v127_v2  ;;  %s95_s22 = sshll.u32 %s152_s1, 4  ;;  %s96_s22 = int_to_ptr.vmem [resolvable:$true] %s95_s22 }
   0x7   :  { %s128_s0 = scalar_lea.vmem %s96_s22, 256  ;;  %p133_p1 = scmp.lt.s32.totalorder %s96_s22, %s96_s22 }
   0x8   :  { %p129_p0 = scmp.ne.s32.totalorder %s96_s22, %s128_s0  ;;  %p134_p2 = scmp.lt.s32.totalorder %s128_s0, %s128_s0 }
   0x9   :  { %118 = vmatmul.mubr.msk.bf16.vlgmr.msra.gmra.mxu0 %vm42_vm1, %v18_v5 }
   0xa   :  { %p135_p3 = por %p134_p2, %p133_p1 }
   0xc   :  { %p136_p4 = pnand %p135_p3, %p129_p0 }
  0xc9   :  { %v80_v7 = vpop.f32.mrf.mxu0 }
  0xca   :  { %v81_v8 = vadd.f32 %v106_v6, %v80_v7 }
  0xcb   :  { %v119_v9 = vpop.f32.mrf.mxu0 }
  0xcc   :  { %88 = vst.msk [vmem:[#allocation2] sm:$0xff] %vm87_vm2, %v81_v8 }
  0xcd   :  { %v83_v10 = vpop.f32.mrf.mxu0 }
  0xce   :  { %v84_v11 = vadd.f32 %v106_v6, %v83_v10 }
  0xcf   :  { %v120_v12 = vpop.f32.mrf.mxu0 }
  0xd0   :  { %89 = vst.msk [vmem:[#allocation2 + $0x8] sm:$0xff] %vm87_vm2, %v84_v11 }
  0xd1   :  { %139 = shalt.err (!%p136_p4)
}
  0xd2   :  { %s153_s2 = smov 128   ;;  %s154_s23 = smov 8  }
  0xd3   :  { %101 = dma.vmem_to_hbm [thread:$0]  %s96_s22, 256, %s196_s3, [#allocation3], %s153_s2, %s153_s2, %s154_s23  }
  0xd4   :  { %148 = dma.done.wait [#allocation3], 256  }
  0xd5   :  { %149 = vsyncadd [#allocation3], 4294967040 }
  0xd6   :  { %105 = vsyncpa [#allocation3], 1 }

</bundles_post_ra>
